<compile_context>
chip_gen: v7x
topology: tpu7x:2x2x1
jax: 0.10.0
libtpu: 0.0.40
codegen_flags: <defaults>
</compile_context>

<pallas_src>
import functools

import jax
import jax.numpy as jnp
from jax.experimental import pallas as pl
from jax.experimental.pallas import tpu as pltpu


# ----------------------------------------------------------------------------
# Stage 1: author nodes.  grid = (author_tiles, paper_tiles[reduction])
#   h_a = author_proj(author_x)                 (dropout = identity in eval)
#   a1  = relu(lin_l(mean_p paper msgs) + lin_r(h_a) + b)     [conv1 author]
#   out = [h_a | a1]  (bf16, lane-dense 2H slab consumed by stage 2)
# ----------------------------------------------------------------------------
def author_stage_kernel(
    author_x_ref,    # [ta, H]   bf16  author features zero-padded to H cols
    A_ap_ref,        # [ta, tp]  bf16  0/1 adjacency tile (author <- paper)
    paper_emb_ref,   # [tp, H]   bf16  paper embedding tile
    inv_deg_a_ref,   # [ta, 1]   f32   1/deg(author)
    w_ref,           # [3, H, H] bf16  w_proj(pad), w1l_pa, w1r_pa
    b_ref,           # [2, H]    f32   b_proj, b1_pa
    out_ref,         # [ta, 2H]  bf16  [h_a | a1]
    acc_ref,         # [ta, H]   f32   scratch accumulator
    *, hidden,
):
    k = pl.program_id(1)

    @pl.when(k == 0)
    def _():
        acc_ref[...] = jnp.zeros_like(acc_ref)

    # Sum of paper messages for this author tile (0/1 weights, f32 accumulation).
    acc_ref[...] += jnp.dot(A_ap_ref[...], paper_emb_ref[...],
                            preferred_element_type=jnp.float32)

    @pl.when(k == pl.num_programs(1) - 1)
    def _():
        H = hidden
        b = b_ref[...]
        # Exact f32 mean via per-row inverse degree, then one bf16 cast.
        agg_a = (acc_ref[...] * inv_deg_a_ref[...]).astype(jnp.bfloat16)
        # Author projection.
        h_a = jnp.dot(author_x_ref[...], w_ref[0],
                      preferred_element_type=jnp.float32) + b[0:1, :]
        h_a_bf = h_a.astype(jnp.bfloat16)
        # conv1 author branch: two dots sharing the f32 accumulator (no concat).
        a1 = (jnp.dot(agg_a, w_ref[1], preferred_element_type=jnp.float32)
              + jnp.dot(h_a_bf, w_ref[2], preferred_element_type=jnp.float32)
              + b[1:2, :])
        a1 = jnp.maximum(a1, 0.0)
        out_ref[:, :H] = h_a_bf
        out_ref[:, H:] = a1.astype(jnp.bfloat16)


# ----------------------------------------------------------------------------
# Stage 2: paper nodes.  grid = (paper_tiles, author_tiles[reduction])
#   [sum h_a | sum a1] = A_pa @ [h_a | a1]      (single A_pa stream)
#   p1 = relu(lin_l(mean h_a) + lin_r(h_p) + b)               [conv1 paper]
#   p2 = relu(lin_l(mean a1)  + lin_r(p1)  + b)               [conv2 paper]
#   y  = clamp(lin2(relu(lin1(p2))), min=0)                   [head, eval]
# ----------------------------------------------------------------------------
def paper_stage_kernel(
    A_pa_ref,        # [tp, ta]  bf16  0/1 adjacency tile (paper <- author)
    ha_a1_ref,       # [ta, 2H]  bf16  stacked [h_a | a1] from stage 1
    paper_emb_ref,   # [tp, H]   bf16
    inv_deg_p_ref,   # [tp, 1]   f32   1/deg(paper)
    w_ref,           # [5, H, H] bf16  w1l_ap, w1r_ap, w2l_ap, w2r_ap, w_lin1
    b_ref,           # [3, H]    f32   b1_ap, b2_ap, b_lin1
    w_lin2_ref,      # [H, OUT_PAD] bf16 (zero-padded to lane-dense width)
    b_lin2_ref,      # [1, OUT_PAD] f32
    out_ref,         # [tp, OUT_PAD] f32
    acc_ref,         # [tp, 2H]  f32 scratch accumulator
    *, hidden,
):
    k = pl.program_id(1)

    @pl.when(k == 0)
    def _():
        acc_ref[...] = jnp.zeros_like(acc_ref)

    # One adjacency stream yields both conv1 and conv2 paper aggregations.
    acc_ref[...] += jnp.dot(A_pa_ref[...], ha_a1_ref[...],
                            preferred_element_type=jnp.float32)

    @pl.when(k == pl.num_programs(1) - 1)
    def _():
        H = hidden
        b = b_ref[...]
        agg = acc_ref[...] * inv_deg_p_ref[...]            # exact f32 mean
        agg_p = agg[:, :H].astype(jnp.bfloat16)
        agg_p2 = agg[:, H:].astype(jnp.bfloat16)
        h_p = paper_emb_ref[...]                           # already bf16
        # conv1 paper branch.
        p1 = (jnp.dot(agg_p, w_ref[0], preferred_element_type=jnp.float32)
              + jnp.dot(h_p, w_ref[1], preferred_element_type=jnp.float32)
              + b[0:1, :])
        p1 = jnp.maximum(p1, 0.0).astype(jnp.bfloat16)
        # conv2 paper branch (author branch of conv2 is never read downstream).
        p2 = (jnp.dot(agg_p2, w_ref[2], preferred_element_type=jnp.float32)
              + jnp.dot(p1, w_ref[3], preferred_element_type=jnp.float32)
              + b[1:2, :])
        p2 = jnp.maximum(p2, 0.0).astype(jnp.bfloat16)
        # Prediction head.
        h = jnp.maximum(jnp.dot(p2, w_ref[4], preferred_element_type=jnp.float32)
                        + b[2:3, :], 0.0).astype(jnp.bfloat16)
        y = jnp.dot(h, w_lin2_ref[...],
                    preferred_element_type=jnp.float32) + b_lin2_ref[...]
        out_ref[...] = jnp.maximum(y, 0.0)                 # eval-mode clamp


# ----------------------------------------------------------------------------
# Wrapper
# ----------------------------------------------------------------------------
def bipartite_citation_gnn(params, author_x, paper_emb, A_pa01, inv_deg_p,
                           A_ap01, inv_deg_a, *, author_in, hidden, out_channels,
                           out_pad=128, tile_p=128, tile_a=128):
    H = hidden
    NA = author_x.shape[0]
    NP = paper_emb.shape[0]
    tile_a = min(tile_a, NA)
    tile_p = min(tile_p, NP)
    assert NA % tile_a == 0 and NP % tile_p == 0, "graph sizes must tile evenly"
    assert author_in <= H

    # --- pack parameters (few DMAs, [in, out] weights so every matmul is x @ W) ---
    w_proj_pad = jnp.zeros((H, H), jnp.float32).at[:author_in, :].set(params["w_proj"])
    w_a_pack = jnp.stack([w_proj_pad, params["w1l_pa"], params["w1r_pa"]], axis=0)
    b_a_pack = jnp.concatenate([params["b_proj"], params["b1_pa"]], axis=0)
    w_p_pack = jnp.stack([params["w1l_ap"], params["w1r_ap"],
                          params["w2l_ap"], params["w2r_ap"], params["w_lin1"]], axis=0)
    b_p_pack = jnp.concatenate([params["b1_ap"], params["b2_ap"], params["b_lin1"]], axis=0)
    w_lin2 = jnp.zeros((H, out_pad), jnp.float32).at[:, :out_channels].set(params["w_lin2"])
    b_lin2 = jnp.zeros((1, out_pad), jnp.float32).at[:, :out_channels].set(params["b_lin2"])

    # bf16 matmul operands, f32 biases / degree scales.
    author_x_pad = jnp.zeros((NA, H), jnp.float32).at[:, :author_in].set(author_x)
    author_x_bf = author_x_pad.astype(jnp.bfloat16)
    paper_emb_bf = paper_emb.astype(jnp.bfloat16)
    A_pa_bf = A_pa01.astype(jnp.bfloat16)   # exact 0/1 (small integer) values
    A_ap_bf = A_ap01.astype(jnp.bfloat16)
    w_a_bf, w_p_bf, w_lin2_bf = (w_a_pack.astype(jnp.bfloat16),
                                 w_p_pack.astype(jnp.bfloat16),
                                 w_lin2.astype(jnp.bfloat16))

    cparams = pltpu.CompilerParams(dimension_semantics=("parallel", "arbitrary"),
                                   vmem_limit_bytes=64 << 20)

    # ---------------- Stage 1: author nodes -> [h_a | a1] ----------------
    flops1 = 2 * (NA * NP * H + 3 * NA * H * H)
    bytes1 = (NA * NP + NA * H + NP * H * (NA // tile_a) + NA * 2 * H) * 2 \
             + (3 * H * H) * 2 + (2 * H + NA) * 4
    ha_a1 = pl.pallas_call(
        functools.partial(author_stage_kernel, hidden=H),
        out_shape=jax.ShapeDtypeStruct((NA, 2 * H), jnp.bfloat16),
        grid_spec=pltpu.PrefetchScalarGridSpec(
            num_scalar_prefetch=0,
            grid=(NA // tile_a, NP // tile_p),
            in_specs=[
                pl.BlockSpec((tile_a, H), lambda i, k: (i, 0)),
                pl.BlockSpec((tile_a, tile_p), lambda i, k: (i, k)),
                pl.BlockSpec((tile_p, H), lambda i, k: (k, 0)),
                pl.BlockSpec((tile_a, 1), lambda i, k: (i, 0)),
                pl.BlockSpec((3, H, H), lambda i, k: (0, 0, 0)),
                pl.BlockSpec((2, H), lambda i, k: (0, 0)),
            ],
            out_specs=pl.BlockSpec((tile_a, 2 * H), lambda i, k: (i, 0)),
            scratch_shapes=[pltpu.VMEM((tile_a, H), jnp.float32)],
        ),
        compiler_params=cparams,
        cost_estimate=pl.CostEstimate(flops=flops1, transcendentals=0,
                                      bytes_accessed=bytes1),
    )(author_x_bf, A_ap_bf, paper_emb_bf, inv_deg_a, w_a_bf, b_a_pack)

    # ---------------- Stage 2: paper nodes -> clamped head output ----------------
    flops2 = 2 * (NP * NA * 2 * H + 5 * NP * H * H + NP * H * out_pad)
    bytes2 = (NP * NA + NA * 2 * H * (NP // tile_p) + NP * H) * 2 \
             + (5 * H * H + H * out_pad) * 2 + (3 * H + out_pad + NP) * 4 \
             + NP * out_pad * 4
    out = pl.pallas_call(
        functools.partial(paper_stage_kernel, hidden=H),
        out_shape=jax.ShapeDtypeStruct((NP, out_pad), jnp.float32),
        grid_spec=pltpu.PrefetchScalarGridSpec(
            num_scalar_prefetch=0,
            grid=(NP // tile_p, NA // tile_a),
            in_specs=[
                pl.BlockSpec((tile_p, tile_a), lambda i, k: (i, k)),
                pl.BlockSpec((tile_a, 2 * H), lambda i, k: (k, 0)),
                pl.BlockSpec((tile_p, H), lambda i, k: (i, 0)),
                pl.BlockSpec((tile_p, 1), lambda i, k: (i, 0)),
                pl.BlockSpec((5, H, H), lambda i, k: (0, 0, 0)),
                pl.BlockSpec((3, H), lambda i, k: (0, 0)),
                pl.BlockSpec((H, out_pad), lambda i, k: (0, 0)),
                pl.BlockSpec((1, out_pad), lambda i, k: (0, 0)),
            ],
            out_specs=pl.BlockSpec((tile_p, out_pad), lambda i, k: (i, 0)),
            scratch_shapes=[pltpu.VMEM((tile_p, 2 * H), jnp.float32)],
        ),
        compiler_params=cparams,
        cost_estimate=pl.CostEstimate(flops=flops2, transcendentals=0,
                                      bytes_accessed=bytes2),
    )(A_pa_bf, ha_a1, paper_emb_bf, inv_deg_p, w_p_bf, b_p_pack, w_lin2_bf, b_lin2)

    return out[:, :out_channels]     # drop lane padding in plain JAX


# ----------------------------------------------------------------------------
# Parameters / graph helpers / pure-JAX f32 reference
# ----------------------------------------------------------------------------
def make_params(key, author_in, hidden, out_ch):
    ks = iter(jax.random.split(key, 32))

    def w(i, o, scale=0.1):
        return jax.random.normal(next(ks), (i, o), jnp.float32) * scale

    def b(o):
        return jax.random.normal(next(ks), (1, o), jnp.float32) * 0.05

    p = {"w_proj": w(author_in, hidden), "b_proj": b(hidden)}
    for c in (1, 2):
        # ('author','writes','paper') SAGEConv: lin_l (W, b), lin_r (W, no bias)
        p[f"w{c}l_ap"], p[f"b{c}_ap"], p[f"w{c}r_ap"] = w(hidden, hidden), b(hidden), w(hidden, hidden)
        # ('paper','written_by','author') SAGEConv
        p[f"w{c}l_pa"], p[f"b{c}_pa"], p[f"w{c}r_pa"] = w(hidden, hidden), b(hidden), w(hidden, hidden)
    p["w_lin1"], p["b_lin1"] = w(hidden, hidden), b(hidden)
    p["w_lin2"], p["b_lin2"] = w(hidden, out_ch), b(out_ch)
    return p


def make_adjacency(dst_idx, src_idx, n_dst, n_src):
    """Dense 0/1(count) adjacency A[dst, src] and exact f32 inverse degree."""
    A = jnp.zeros((n_dst, n_src), jnp.float32).at[dst_idx, src_idx].add(1.0)
    deg = A.sum(axis=1, keepdims=True)
    return A, 1.0 / jnp.maximum(deg, 1.0)


def reference_forward(p, author_x, paper_emb, A_pa, inv_deg_p, A_ap, inv_deg_a):
    """Pure-JAX f32 reference of the torch forward (eval mode, paper output)."""
    relu = jax.nn.relu
    h_a = author_x @ p["w_proj"] + p["b_proj"]
    h_p = paper_emb
    agg_p = (A_pa @ h_a) * inv_deg_p
    agg_a = (A_ap @ h_p) * inv_deg_a
    p1 = relu(agg_p @ p["w1l_ap"] + h_p @ p["w1r_ap"] + p["b1_ap"])
    a1 = relu(agg_a @ p["w1l_pa"] + h_a @ p["w1r_pa"] + p["b1_pa"])
    agg_p2 = (A_pa @ a1) * inv_deg_p
    p2 = relu(agg_p2 @ p["w2l_ap"] + p1 @ p["w2r_ap"] + p["b2_ap"])
    h = relu(p2 @ p["w_lin1"] + p["b_lin1"])
    return jnp.maximum(h @ p["w_lin2"] + p["b_lin2"], 0.0)


if __name__ == "__main__":
    # Small synthetic bipartite citation graph (hidden_channels=64 as in the spec).
    num_authors, num_papers = 256, 256
    author_in_channels, hidden_channels, out_channels = 8, 64, 1
    num_edges = 2048

    key = jax.random.PRNGKey(0)
    k_e1, k_e2, k_x, k_emb, k_par = jax.random.split(key, 5)

    # edge_index for ('author','writes','paper'); ('paper','written_by','author') is its reverse.
    a_idx = jax.random.randint(k_e1, (num_edges,), 0, num_authors)
    p_idx = jax.random.randint(k_e2, (num_edges,), 0, num_papers)
    A_pa, inv_deg_p = make_adjacency(p_idx, a_idx, num_papers, num_authors)  # paper <- author
    A_ap, inv_deg_a = make_adjacency(a_idx, p_idx, num_authors, num_papers)  # author <- paper

    author_x = jax.random.normal(k_x, (num_authors, author_in_channels), jnp.float32)
    paper_embedding_weight = jax.random.normal(k_emb, (num_papers, hidden_channels), jnp.float32)

    params = make_params(k_par, author_in_channels, hidden_channels, out_channels)

    out = bipartite_citation_gnn(params, author_x, paper_embedding_weight,
                                 A_pa, inv_deg_p, A_ap, inv_deg_a,
                                 author_in=author_in_channels, hidden=hidden_channels,
                                 out_channels=out_channels)
    out = jax.block_until_ready(out)

    ref = reference_forward(params, author_x, paper_embedding_weight,
                            A_pa, inv_deg_p, A_ap, inv_deg_a)

    assert out.shape == (num_papers, out_channels)
    assert bool(jnp.all(jnp.isfinite(out)))
    assert bool(jnp.all(out >= 0.0))          # eval-mode clamp
    err = float(jnp.max(jnp.abs(out - ref)))
    scale = float(jnp.max(jnp.abs(ref))) + 1e-6
    assert err <= 0.05 * scale + 0.05, f"max abs err {err} vs ref scale {scale}"
    print("KERNEL_OK")
</pallas_src>

<mosaic_0001>
module attributes {stable_mosaic.version = 11 : i64} {
  func.func @author_stage_kernel(%arg0: i32, %arg1: i32, %arg2: memref<128x64xbf16, #tpu.memory_space<vmem>>, %arg3: memref<128x128xbf16, #tpu.memory_space<vmem>>, %arg4: memref<128x64xbf16, #tpu.memory_space<vmem>>, %arg5: memref<128x1xf32, #tpu.memory_space<vmem>>, %arg6: memref<3x64x64xbf16, #tpu.memory_space<vmem>>, %arg7: memref<2x64xf32, #tpu.memory_space<vmem>>, %arg8: memref<128x128xbf16, #tpu.memory_space<vmem>>, %arg9: memref<128x64xf32, #tpu.memory_space<vmem>>) attributes {dimension_semantics = [#tpu.dimension_semantics<parallel>, #tpu.dimension_semantics<arbitrary>], iteration_bounds = array<i64: 2, 2>, scalar_prefetch = 0 : i64, scratch_operands = 1 : i64, tpu.core_type = #tpu.core_type<tc>, window_params = [{transform_indices = @transform_0, window_bounds = array<i64: 128, 64>}, {transform_indices = @transform_1, window_bounds = array<i64: 128, 128>}, {transform_indices = @transform_2, window_bounds = array<i64: 128, 64>}, {transform_indices = @transform_3, window_bounds = array<i64: 128, 1>}, {pipeline_mode = #tpu.pipeline_mode<synchronous>, transform_indices = @transform_4, window_bounds = array<i64: 3, 64, 64>}, {pipeline_mode = #tpu.pipeline_mode<synchronous>, transform_indices = @transform_5, window_bounds = array<i64: 2, 64>}, {transform_indices = @transform_6, window_bounds = array<i64: 128, 128>}]} {
    %c0_i32 = arith.constant 0 : i32
    %0 = arith.cmpi eq, %arg1, %c0_i32 : i32
    %1 = arith.extui %0 : i1 to i32
    %c0_i32_0 = arith.constant 0 : i32
    %2 = arith.cmpi ne, %1, %c0_i32_0 : i32
    scf.if %2 {
      %cst_9 = arith.constant 0.000000e+00 : f32
      %12 = vector.broadcast %cst_9 : f32 to vector<128x64xf32>
      %c0_10 = arith.constant 0 : index
      %c0_11 = arith.constant 0 : index
      %13 = vector.load %arg9[%c0_10, %c0_11] : memref<128x64xf32, #tpu.memory_space<vmem>>, vector<128x64xf32>
      tpu.vector_store %arg9[%c0_10, %c0_11], %12 {strides = array<i32>} : memref<128x64xf32, #tpu.memory_space<vmem>>, vector<128x64xf32>,
    } else {
    }
    %c0 = arith.constant 0 : index
    %c0_1 = arith.constant 0 : index
    %3 = vector.load %arg9[%c0, %c0_1] : memref<128x64xf32, #tpu.memory_space<vmem>>, vector<128x64xf32>
    %c0_2 = arith.constant 0 : index
    %c0_3 = arith.constant 0 : index
    %4 = vector.load %arg3[%c0_2, %c0_3] : memref<128x128xbf16, #tpu.memory_space<vmem>>, vector<128x128xbf16>
    %c0_4 = arith.constant 0 : index
    %c0_5 = arith.constant 0 : index
    %5 = vector.load %arg4[%c0_4, %c0_5] : memref<128x64xbf16, #tpu.memory_space<vmem>>, vector<128x64xbf16>
    %cst = arith.constant dense<0.000000e+00> : vector<128x64xf32>
    %6 = tpu.matmul %4, %5, %cst {dimension_numbers = #tpu.dot_dimension_numbers<[1], [0], [0], [1], [0, 0, 1, 1], [], []>} : vector<128x128xbf16>, vector<128x64xbf16>, vector<128x64xf32> -> vector<128x64xf32>
    %7 = arith.addf %3, %6 : vector<128x64xf32>
    %c0_6 = arith.constant 0 : index
    %c0_7 = arith.constant 0 : index
    %8 = vector.load %arg9[%c0_6, %c0_7] : memref<128x64xf32, #tpu.memory_space<vmem>>, vector<128x64xf32>
    tpu.vector_store %arg9[%c0_6, %c0_7], %7 {strides = array<i32>} : memref<128x64xf32, #tpu.memory_space<vmem>>, vector<128x64xf32>,
    %c1_i32 = arith.constant 1 : i32
    %9 = arith.cmpi eq, %arg1, %c1_i32 : i32
    %10 = arith.extui %9 : i1 to i32
    %c0_i32_8 = arith.constant 0 : i32
    %11 = arith.cmpi ne, %10, %c0_i32_8 : i32
    scf.if %11 {
      %c0_9 = arith.constant 0 : index
      %c0_10 = arith.constant 0 : index
      %12 = vector.load %arg7[%c0_9, %c0_10] : memref<2x64xf32, #tpu.memory_space<vmem>>, vector<2x64xf32>
      %c0_11 = arith.constant 0 : index
      %c0_12 = arith.constant 0 : index
      %13 = vector.load %arg9[%c0_11, %c0_12] : memref<128x64xf32, #tpu.memory_space<vmem>>, vector<128x64xf32>
      %c0_13 = arith.constant 0 : index
      %c0_14 = arith.constant 0 : index
      %14 = vector.load %arg5[%c0_13, %c0_14] : memref<128x1xf32, #tpu.memory_space<vmem>>, vector<128x1xf32>
      %15 = vector.broadcast %14 : vector<128x1xf32> to vector<128x64xf32>
      %16 = arith.mulf %13, %15 : vector<128x64xf32>
      %17 = arith.truncf %16 : vector<128x64xf32> to vector<128x64xbf16>
      %c0_15 = arith.constant 0 : index
      %c0_16 = arith.constant 0 : index
      %18 = vector.load %arg2[%c0_15, %c0_16] : memref<128x64xbf16, #tpu.memory_space<vmem>>, vector<128x64xbf16>
      %c0_17 = arith.constant 0 : index
      %c0_18 = arith.constant 0 : index
      %c0_19 = arith.constant 0 : index
      %19 = vector.load %arg6[%c0_17, %c0_18, %c0_19] : memref<3x64x64xbf16, #tpu.memory_space<vmem>>, vector<1x64x64xbf16>
      %20 = vector.shape_cast %19 : vector<1x64x64xbf16> to vector<64x64xbf16>
      %cst_20 = arith.constant dense<0.000000e+00> : vector<128x64xf32>
      %21 = tpu.matmul %18, %20, %cst_20 {dimension_numbers = #tpu.dot_dimension_numbers<[1], [0], [0], [1], [0, 0, 1, 1], [], []>} : vector<128x64xbf16>, vector<64x64xbf16>, vector<128x64xf32> -> vector<128x64xf32>
      %22 = vector.extract_strided_slice %12 {offsets = [0, 0], sizes = [1, 64], strides = [1, 1]} : vector<2x64xf32> to vector<1x64xf32>
      %23 = vector.broadcast %22 : vector<1x64xf32> to vector<128x64xf32>
      %24 = arith.addf %21, %23 : vector<128x64xf32>
      %25 = arith.truncf %24 : vector<128x64xf32> to vector<128x64xbf16>
      %c1 = arith.constant 1 : index
      %c0_21 = arith.constant 0 : index
      %c0_22 = arith.constant 0 : index
      %26 = vector.load %arg6[%c1, %c0_21, %c0_22] : memref<3x64x64xbf16, #tpu.memory_space<vmem>>, vector<1x64x64xbf16>
      %27 = vector.shape_cast %26 : vector<1x64x64xbf16> to vector<64x64xbf16>
      %cst_23 = arith.constant dense<0.000000e+00> : vector<128x64xf32>
      %28 = tpu.matmul %17, %27, %cst_23 {dimension_numbers = #tpu.dot_dimension_numbers<[1], [0], [0], [1], [0, 0, 1, 1], [], []>} : vector<128x64xbf16>, vector<64x64xbf16>, vector<128x64xf32> -> vector<128x64xf32>
      %c2 = arith.constant 2 : index
      %c0_24 = arith.constant 0 : index
      %c0_25 = arith.constant 0 : index
      %29 = vector.load %arg6[%c2, %c0_24, %c0_25] : memref<3x64x64xbf16, #tpu.memory_space<vmem>>, vector<1x64x64xbf16>
      %30 = vector.shape_cast %29 : vector<1x64x64xbf16> to vector<64x64xbf16>
      %cst_26 = arith.constant dense<0.000000e+00> : vector<128x64xf32>
      %31 = tpu.matmul %25, %30, %cst_26 {dimension_numbers = #tpu.dot_dimension_numbers<[1], [0], [0], [1], [0, 0, 1, 1], [], []>} : vector<128x64xbf16>, vector<64x64xbf16>, vector<128x64xf32> -> vector<128x64xf32>
      %32 = arith.addf %28, %31 : vector<128x64xf32>
      %33 = vector.extract_strided_slice %12 {offsets = [1, 0], sizes = [1, 64], strides = [1, 1]} : vector<2x64xf32> to vector<1x64xf32>
      %34 = vector.broadcast %33 : vector<1x64xf32> to vector<128x64xf32>
      %35 = arith.addf %32, %34 : vector<128x64xf32>
      %cst_27 = arith.constant 0.000000e+00 : f32
      %36 = vector.broadcast %cst_27 : f32 to vector<128x64xf32>
      %37 = arith.maximumf %35, %36 : vector<128x64xf32>
      %c0_28 = arith.constant 0 : index
      %c0_29 = arith.constant 0 : index
      %38 = vector.load %arg8[%c0_28, %c0_29] : memref<128x128xbf16, #tpu.memory_space<vmem>>, vector<128x64xbf16>
      tpu.vector_store %arg8[%c0_28, %c0_29], %25 {strides = array<i32>} : memref<128x128xbf16, #tpu.memory_space<vmem>>, vector<128x64xbf16>,
      %39 = arith.truncf %37 : vector<128x64xf32> to vector<128x64xbf16>
      %c0_30 = arith.constant 0 : index
      %c64 = arith.constant 64 : index
      %40 = vector.load %arg8[%c0_30, %c64] : memref<128x128xbf16, #tpu.memory_space<vmem>>, vector<128x64xbf16>
      tpu.vector_store %arg8[%c0_30, %c64], %39 {strides = array<i32>} : memref<128x128xbf16, #tpu.memory_space<vmem>>, vector<128x64xbf16>,
    } else {
    }
    return
  }
  func.func @transform_0(%arg0: i32, %arg1: i32) -> (i32, i32) {
    %c0_i32 = arith.constant 0 : i32
    %c0_i32_0 = arith.constant 0 : i32
    return %arg0, %c0_i32 : i32, i32
  }
  func.func @transform_1(%arg0: i32, %arg1: i32) -> (i32, i32) {
    %c0_i32 = arith.constant 0 : i32
    return %arg0, %arg1 : i32, i32
  }
  func.func @transform_2(%arg0: i32, %arg1: i32) -> (i32, i32) {
    %c0_i32 = arith.constant 0 : i32
    %c0_i32_0 = arith.constant 0 : i32
    return %arg1, %c0_i32 : i32, i32
  }
  func.func @transform_3(%arg0: i32, %arg1: i32) -> (i32, i32) {
    %c0_i32 = arith.constant 0 : i32
    %c0_i32_0 = arith.constant 0 : i32
    return %arg0, %c0_i32 : i32, i32
  }
  func.func @transform_4(%arg0: i32, %arg1: i32) -> (i32, i32, i32) {
    %c0_i32 = arith.constant 0 : i32
    %c0_i32_0 = arith.constant 0 : i32
    %c0_i32_1 = arith.constant 0 : i32
    %c0_i32_2 = arith.constant 0 : i32
    return %c0_i32, %c0_i32_0, %c0_i32_1 : i32, i32, i32
  }
  func.func @transform_5(%arg0: i32, %arg1: i32) -> (i32, i32) {
    %c0_i32 = arith.constant 0 : i32
    %c0_i32_0 = arith.constant 0 : i32
    %c0_i32_1 = arith.constant 0 : i32
    return %c0_i32, %c0_i32_0 : i32, i32
  }
  func.func @transform_6(%arg0: i32, %arg1: i32) -> (i32, i32) {
    %c0_i32 = arith.constant 0 : i32
    %c0_i32_0 = arith.constant 0 : i32
    return %arg0, %c0_i32 : i32, i32
  }
}

</mosaic_0001>

<bundles_post_ra>
// kernel: tpu_custom_call.1
= control target key start
LH: loop header
LB: loop body
LE: loop exit
PB: predicated region body
PF: predicated region fallthrough
CT: control target
= control target key end

     0   :  { %s3537_s0 = inlined_call_operand.hbm [shape: bf16[256,64], index: 0, kind: input, shape index: {}]   ;;  %s3538_s1 = inlined_call_operand.hbm [shape: bf16[256,256], index: 1, kind: input, shape index: {}]   ;;  %s3539_s2 = inlined_call_operand.hbm [shape: bf16[256,64], index: 2, kind: input, shape index: {}]   ;;  %s3540_s3 = inlined_call_operand.hbm [shape: f32[256,1], index: 3, kind: input, shape index: {}]   ;;  %s3541_s4 = inlined_call_operand.hbm [shape: bf16[3,64,64], index: 4, kind: input, shape index: {}]   ;;  %s3542_s5 = inlined_call_operand.hbm [shape: f32[2,64], index: 5, kind: input, shape index: {}]   ;;  %s3543_s6 = inlined_call_operand.hbm [shape: bf16[256,128], index: 6, kind: output, shape index: {}]  }
   0x1   :  { %3571 = sst [smem:[#allocation34_spill]] %s3537_s0 }
   0x2   :  { %3572 = sst [smem:[#allocation35_spill]] %s3538_s1 }
   0x3   :  { %3573 = sst [smem:[#allocation36_spill]] %s3539_s2 }
   0x4   :  { %3574 = sst [smem:[#allocation37_spill]] %s3540_s3 }
   0x5   :  { %3575 = sst [smem:[#allocation38_spill]] %s3541_s4 }
   0x6   :  { %3576 = sst [smem:[#allocation39_spill]] %s3542_s5 }
   0x7   :  { %3577 = sst [smem:[#allocation40_spill]] %s3543_s6 }
   0x8   :  { %11 = vsyncpa [#allocation4], 0 }
   0x9   :  { %13 = vsyncpa [#allocation4 + $0x1], 0 }
   0xa   :  { %14 = vsyncpa [#allocation7], 0 }
   0xb   :  { %16 = vsyncpa [#allocation7 + $0x1], 0 }
   0xc   :  { %17 = vsyncpa [#allocation10], 0 }
   0xd   :  { %19 = vsyncpa [#allocation10 + $0x1], 0 }
   0xe   :  { %20 = vsyncpa [#allocation13], 0 }
   0xf   :  { %21 = vsyncpa [#allocation5], 0 }
  0x10   :  { %23 = vsyncpa [#allocation5 + $0x1], 0  ;;  %s2771_s21 = smov 0   ;;  %s2773_s22 = smov 0  }
  0x11   :  { %s2775_s23 = smov 0   ;;  %s2777_s24 = smov 0  }
  0x12   :  { %s2779_s25 = smov 0   ;;  %s2781_s26 = smov 0  }
  0x13   :  { %s2783_s27 = smov 0   ;;  %s2785_s28 = smov 0  }
  0x14   :  { %s2787_s29 = smov 0   ;;  %s2789_s30 = smov 0  }
  0x15   :  { %s2791_s7 = smov 0   ;;  %s2793_s8 = smov 0  }
  0x16   :  { %s2795_s9 = smov 0   ;;  %s2797_s10 = smov 0  }
  0x17 LB: > { %3578 = sst [smem:[#allocation22_spill]] %s2666_s21  ;;  %s2842_s11 = sadd.s32 4294967295, %s2718_s10   ;;  %s2718_s10 = sphi %s2797_s10, %s29_s10   ;;  %s2714_s9 = sphi %s2795_s9, %s3663_s9   ;;  %s2710_s8 = sphi %s2793_s8, %s3662_s8   ;;  %s2706_s7 = sphi %s2791_s7, %s3661_s7   ;;  %s2702_s30 = sphi %s2789_s30, %s3660_s30   ;;  %s2698_s29 = sphi %s2787_s29, %s3650_s29   ;;  %s2694_s28 = sphi %s2785_s28, %s3659_s28   ;;  %s2690_s27 = sphi %s2783_s27, %s3658_s27   ;;  %s2686_s26 = sphi %s2781_s26, %s3657_s26   ;;  %s2682_s25 = sphi %s2779_s25, %s3656_s25   ;;  %s2678_s24 = sphi %s2777_s24, %s3647_s24   ;;  %s2674_s23 = sphi %s2775_s23, %s3655_s23   ;;  %s2670_s22 = sphi %s2773_s22, %s3654_s22   ;;  %s2666_s21 = sphi %s2771_s21, %s3653_s21  }
  0x18   : > { %3579 = sst [smem:[#allocation23_spill]] %s2682_s25  ;;  %p1810_p0 = scmp.ge.s32.totalorder %s2718_s10, 1 }
  0x19   : > { %3580 = sst [smem:[#allocation24_spill]] %s2698_s29  ;;  %p3545_p1 = scmp.eq.s32.totalorder %s2842_s11, 0 }
  0x1a   : > { %3581 = sst [smem:[#allocation25_spill]] %s2702_s30  ;;  %p220_p3 = scmp.lt.s32.totalorder %s2718_s10, 5 }
  0x1b   : > { %3582 = sst [smem:[#allocation26_spill]] %s2706_s7  ;;  %s2720_s13 = smov [#allocation11]  }
  0x1c   : > { %p2848_p4 = pnand %p1810_p0, %p220_p3  ;;  %s232_s14 = sshll.u32 %s2720_s13, 4  ;;  %s233_s14 = int_to_ptr.vmem [resolvable:$true] %s232_s14 }
  0x1d   : > { %s3586_s4 = sld [smem:[#allocation38_spill]] }
  0x1e   : > { %s3583_s12 = scalar_select %p2848_p4, 1, 0 }
  0x1f   : > { %p2185_p5 = pneg %p2848_p4 }
  0x20   : > { %3584 = sst [smem:[#allocation27_spill]] %s3583_s12 }
  0x21   : > { %p2856_p6 = pnand %p2185_p5, %p3545_p1 }
  0x23   : > { %s2376_s18 = scalar_lea.hbm %s3586_s4, 1536  ;;  %p3560_p8 = pneg %p2856_p6 }
  0x24   : > { %p2377_p7 = scmp.ne.s32.totalorder %s3586_s4, %s2376_s18  ;;  %p2383_p11 = scmp.lt.u32.totalorder %s2376_s18, %s3586_s4 }
  0x26   : > { %p2379_p9 = pnand %p3560_p8, %p2377_p7 }
  0x28   : > { %p2380_p10 = pneg %p2379_p9 }
  0x2a   : > { %p2385_p12 = pnand %p2383_p11, %p2380_p10 }
  0x2c   : > { %2388 = shalt.err (!%p2385_p12)
}
  0x2d   : > { %s2389_s16 = scalar_lea.vmem %s233_s14, 1536  ;;  %p2397_p5 = scmp.lt.s32.totalorder %s233_s14, %s233_s14 }
  0x2e   : > { %p2390_p13 = scmp.ne.s32.totalorder %s233_s14, %s2389_s16  ;;  %p2398_p2 = scmp.lt.s32.totalorder %s2389_s16, %s2389_s16 }
  0x30   : > { %p2392_p0 = pnand %p2390_p13, %p3560_p8  ;;  %p2399_p1 = por %p2398_p2, %p2397_p5 }
  0x32   : > { %p2393_p3 = pneg %p2392_p0 }
  0x34   : > { %p2400_p4 = pnand %p2399_p1, %p2393_p3 }
  0x36   : > { %2403 = shalt.err (!%p2400_p4)
}
  0x37   : > { %s3547_s17 = smov 64   ;;  %s3549_s6 = smov 4  }
  0x38   : > { %2188 = dma.hbm_to_vmem [thread:$0]  (!%p2856_p6), %s3586_s4, 1536, %s233_s14, [#allocation10], %s3547_s17, %s3547_s17, %s3549_s6  }
  0x39   : > { %s38_s20 = sadd.s32 1, %s2710_s8  ;;  %s41_s13 = sadd.s32 1, %s2714_s9 }
  0x3a   : > { %p39_p1 = scmp.ge.s32.totalorder %s38_s20, 2  ;;  %p3559_p2 = scmp.eq.s32.totalorder %s2718_s10, 0 }
  0x3b   : > { %s76_s16 = sadd.s32 1, %s2686_s26  ;;  %p83_p4 = scmp.ne.s32.totalorder %s2686_s26, %s2682_s25 }
  0x3c   : > { %s3665_s20 = smov (%p39_p1, %s38_s20), 0  ;;  %s3667_s13 = smov (!%p39_p1, %s41_s13), %s2714_s9 }
  0x3d   : > { %3587 = sst [smem:[#allocation28_spill]] %s3665_s20  ;;  %s2896_s7 = ssub.s32 %s2710_s8, %s3665_s20 }
  0x3e   : > { %p2900_p7 = por %p83_p4, %p3559_p2  ;;  %p43_p9 = scmp.ge.s32.totalorder %s3667_s13, 2 }
  0x3f   : > { %p89_p10 = scmp.ne.s32.totalorder %s2682_s25, %s2678_s24  ;;  %p3558_p12 = scmp.lt.s32.totalorder %s2718_s10, 4 }
  0x40   : > { %s3669_s13 = smov (%p43_p9, %s3667_s13), 0  ;;  %p3590_p13 = scmp.eq.s32.totalorder %s2842_s11, 0 }
  0x41   : > { %3589 = sst [smem:[#allocation29_spill]] %s3669_s13  ;;  %s2919_s17 = ssub.s32 %s2714_s9, %s3669_s13 }
  0x42   : > { %p2912_p0 = por %p89_p10, %p3590_p13  ;;  %s73_s6 = sor.u32 %s2896_s7, %s2919_s17 }
  0x43   : > { %s280_s4 = sand.u32 1, %s2686_s26   ;;  %p74_p3 = scmp.eq.s32.totalorder %s73_s6, 0 }
  0x44   : > { %s3591_s18 = scalar_select %p2912_p0, 1, 0 }
  0x45   : > { %s1817_s24 = sshll.u32 %s280_s4, 6  ;;  %s1935_s20 = sshll.u32 %s2714_s9, 5 }
  0x46   : > { %3592 = sst [smem:[#allocation30_spill]] %s3591_s18  ;;  %s288_s25 = sadd.s32 %s2710_s8, %s1935_s20 }
  0x47   : > { %s2926_s30 = scalar_select %p74_p3, %s2686_s26, %s76_s16  }
  0x48   : > { %s282_s12 = scalar_lea.vmem [#allocation6], %s1817_s24  ;;  %s1820_s2 = sshll.u32 %s288_s25, 6 }
  0x49   : > { %3593 = sst [smem:[#allocation31_spill]] %s2926_s30  ;;  %s291_s3 = sshll.u32 %s282_s12, 4  ;;  %s2929_s3 = int_to_ptr.vmem [resolvable:$true] %s291_s3 }
  0x4a   : > { %s3594_s1 = sld [smem:[#allocation35_spill]]  ;;  %p2940_p5 = pnand %p3558_p12, %p2900_p7 }
  0x4b   : > { %s2723_s25 = smov [#allocation12]   ;;  %s3596_s6 = sand.u32 1, %s2718_s10  }
  0x4c   : > { %s2944_s12 = sshll.u32 %s2723_s25, 4  ;;  %s2948_s20 = scalar_lea.sflag [#allocation7], %s3596_s6  ;;  %s247_s12 = int_to_ptr.vmem [resolvable:$true] %s2944_s12 }
  0x4d   : > { %p2406_p4 = pneg %p2940_p5 }
  0x50   : > { %s2934_s19 = scalar_lea.hbm %s3594_s1, %s1820_s2  ;;  %s2409_s14 = scalar_lea.hbm %s3594_s1, 4096 }
  0x51   : > { %s2404_s2 = scalar_lea.hbm %s2934_s19, 1024  ;;  %p2410_p7 = scmp.lt.u32.totalorder %s2934_s19, %s3594_s1 }
  0x52   : > { %p2405_p1 = scmp.ne.s32.totalorder %s2934_s19, %s2404_s2  ;;  %p2411_p13 = scmp.lt.u32.totalorder %s2409_s14, %s2404_s2 }
  0x53   : > { %p2413_p11 = scmp.lt.u32.totalorder %s2404_s2, %s2934_s19 }
  0x54   : > { %p2407_p9 = pnand %p2406_p4, %p2405_p1  ;;  %p2412_p3 = por %p2411_p13, %p2410_p7 }
  0x56   : > { %p2408_p10 = pneg %p2407_p9  ;;  %p2414_p12 = por %p2413_p11, %p2412_p3 }
  0x58   : > { %p2415_p2 = pnand %p2414_p12, %p2408_p10 }
  0x5a   : > { %2418 = shalt.err (!%p2415_p2)
}
  0x5b   : > { %s2419_s25 = scalar_lea.vmem %s2929_s3, 1024  ;;  %s2724_s6 = smov [#allocation6]  }
  0x5c   : > { %p2420_p1 = scmp.ne.s32.totalorder %s2929_s3, %s2419_s25  ;;  %s2424_s21 = sshll.u32 %s2724_s6, 4  ;;  %s2425_s21 = int_to_ptr.vmem [resolvable:$false] %s2424_s21 }
  0x5d   : > { %s2426_s16 = scalar_lea.vmem %s2425_s21, 2048  ;;  %p2427_p0 = scmp.lt.s32.totalorder %s2929_s3, %s2425_s21 }
  0x5e   : > { %p2422_p9 = pnand %p2420_p1, %p2406_p4  ;;  %p2428_p7 = scmp.lt.s32.totalorder %s2426_s16, %s2419_s25 }
  0x60   : > { %p2423_p8 = pneg %p2422_p9  ;;  %p2429_p13 = por %p2428_p7, %p2427_p0 }
  0x62   : > { %p2430_p11 = pnand %p2429_p13, %p2423_p8 }
  0x64   : > { %2433 = shalt.err (!%p2430_p11)
}
  0x65   : > { %s3562_s2 = smov 128   ;;  %s3597_s14 = smov 4  }
  0x66   : > { %s3598_s18 = smov 64   ;;  %s3599_s5 = sld [smem:[#allocation39_spill]] }
  0x67   : > { %2198 = dma.hbm_to_vmem [thread:$0]  (!%p2940_p5), %s2934_s19, 1024, %s2929_s3, %s2948_s20, %s3562_s2, %s3598_s18, %s3597_s14  }
  0x68   : > { %p3600_p2 = pneg %p2856_p6 }
  0x6c   : > { %s2434_s25 = scalar_lea.hbm %s3599_s5, 32 }
  0x6d   : > { %p2435_p8 = scmp.ne.s32.totalorder %s3599_s5, %s2434_s25  ;;  %p2441_p4 = scmp.lt.u32.totalorder %s2434_s25, %s3599_s5 }
  0x6f   : > { %p2437_p12 = pnand %p2435_p8, %p3600_p2 }
  0x71   : > { %p2438_p0 = pneg %p2437_p12 }
  0x73   : > { %p2443_p10 = pnand %p2441_p4, %p2438_p0 }
  0x75   : > { %2446 = shalt.err (!%p2443_p10)
}
  0x76   : > { %s2447_s3 = scalar_lea.vmem %s247_s12, 32  ;;  %p3601_p3 = pmov %p3600_p2 }
  0x77   : > { %p2448_p5 = scmp.ne.s32.totalorder %s247_s12, %s2447_s3  ;;  %p2455_p7 = scmp.lt.s32.totalorder %s247_s12, %s247_s12 }
  0x78   : > { %p2456_p13 = scmp.lt.s32.totalorder %s2447_s3, %s2447_s3 }
  0x79   : > { %p2450_p1 = pnand %p2448_p5, %p3601_p3 }
  0x7a   : > { %p2457_p11 = por %p2456_p13, %p2455_p7 }
  0x7b   : > { %p2451_p9 = pneg %p2450_p1 }
  0x7d   : > { %p2458_p2 = pnand %p2457_p11, %p2451_p9 }
  0x7f   : > { %2461 = shalt.err (!%p2458_p2)
}
  0x80   : > { %2191 = dma.hbm_to_vmem [thread:$0]  (!%p2856_p6), %s3599_s5, 32, %s247_s12, [#allocation13]  }
  0x81   : > { %s1809_s1 = sadd.s32 4294967294, %s2718_s10   ;;  %p46_p8 = scmp.eq.s32.totalorder %s2919_s17, 0 }
  0x82   : > { %s48_s15 = sadd.s32 1, %s2698_s29  ;;  %p55_p12 = scmp.ne.s32.totalorder %s2698_s29, %s2694_s28 }
  0x83   : > { %p61_p0 = scmp.ne.s32.totalorder %s2694_s28, %s2690_s27  ;;  %p3603_p4 = scmp.eq.s32.totalorder %s2718_s10, 0 }
  0x84   : > { %s3008_s6 = scalar_select %p46_p8, %s2698_s29, %s48_s15  }
  0x85   : > { %p57_p10 = por %p3603_p4, %p55_p12  ;;  %p3604_p5 = scmp.eq.s32.totalorder %s2842_s11, 0 }
  0x86   : > { %3602 = sst [smem:[#allocation32_spill]] %s3008_s6  ;;  %p3606_p1 = scmp.eq.s32.totalorder %s2842_s11, 3 }
  0x87   : > { %p3014_p3 = por %p3604_p5, %p61_p0  ;;  %p213_p6 = scmp.eq.s32.totalorder %s1809_s1, 3 }
  0x88   : > { %p3020_p9 = por %p3606_p1, %p55_p12  ;;  %s3025_s12 = sand.u32 1, %s2698_s29  }
  0x89   : > { %s3605_s25 = scalar_select %p3014_p3, 1, 0 }
  0x8a   : > { %s3607_s21 = scalar_select %p3020_p9, 1, 0 }
  0x8b   : > { %s1934_s17 = sshll.u32 %s2714_s9, 10  ;;  %p3028_p7 = por %p213_p6, %p61_p0 }
  0x8c   : > { %s1814_s4 = sshll.u32 %s3025_s12, 6  ;;  %s3610_s0 = sld [smem:[#allocation34_spill]] }
  0x8d   : > { %s3608_s16 = scalar_select %p3028_p7, 1, 0 }
  0x8e   : > { %p3611_p13 = scmp.lt.s32.totalorder %s2718_s10, 4  ;;  %s261_s15 = scalar_lea.vmem [#allocation3], %s1814_s4 }
  0x8f   : > { %3609 = sst [smem:[#allocation33_spill]] %s3608_s16  ;;  %s268_s2 = sshll.u32 %s261_s15, 4  ;;  %s3044_s2 = int_to_ptr.vmem [resolvable:$true] %s268_s2 }
  0x90   : > { %p3040_p11 = pnand %p3611_p13, %p57_p10  ;;  %s258_s5 = scalar_lea.sflag [#allocation4], %s3025_s12 }
  0x92   : > { %s3036_s24 = scalar_lea.hbm %s3610_s0, %s1934_s17  ;;  %p3567_p8 = pneg %p3040_p11 }
  0x93   : > { %s2462_s13 = scalar_lea.hbm %s3036_s24, 1024  ;;  %s2467_s19 = scalar_lea.hbm %s3610_s0, 2048 }
  0x94   : > { %p2463_p2 = scmp.ne.s32.totalorder %s3036_s24, %s2462_s13  ;;  %p2468_p4 = scmp.lt.u32.totalorder %s3036_s24, %s3610_s0 }
  0x95   : > { %p2469_p10 = scmp.lt.u32.totalorder %s2467_s19, %s2462_s13  ;;  %p2471_p1 = scmp.lt.u32.totalorder %s2462_s13, %s3036_s24 }
  0x96   : > { %p2465_p12 = pnand %p3567_p8, %p2463_p2 }
  0x97   : > { %p2470_p5 = por %p2469_p10, %p2468_p4 }
  0x98   : > { %p2466_p0 = pneg %p2465_p12 }
  0x99   : > { %p2472_p6 = por %p2471_p1, %p2470_p5 }
  0x9b   : > { %p2473_p13 = pnand %p2472_p6, %p2466_p0 }
  0x9d   : > { %2476 = shalt.err (!%p2473_p13)
}
  0x9e   : > { %s2477_s4 = scalar_lea.vmem %s3044_s2, 1024  ;;  %s2726_s15 = smov [#allocation3]  }
  0x9f   : > { %p2478_p2 = scmp.ne.s32.totalorder %s3044_s2, %s2477_s4  ;;  %s2482_s17 = sshll.u32 %s2726_s15, 4  ;;  %s2483_s17 = int_to_ptr.vmem [resolvable:$false] %s2482_s17 }
  0xa0   : > { %s2484_s29 = scalar_lea.vmem %s2483_s17, 2048  ;;  %p2485_p9 = scmp.lt.s32.totalorder %s3044_s2, %s2483_s17 }
  0xa1   : > { %p2480_p12 = pnand %p2478_p2, %p3567_p8  ;;  %p2486_p4 = scmp.lt.s32.totalorder %s2484_s29, %s2477_s4 }
  0xa3   : > { %p2481_p7 = pneg %p2480_p12  ;;  %p2487_p10 = por %p2486_p4, %p2485_p9 }
  0xa5   : > { %p2488_p5 = pnand %p2487_p10, %p2481_p7 }
  0xa7   : > { %2491 = shalt.err (!%p2488_p5)
}
  0xa8   : > { %s3613_s13 = sld [smem:[#allocation22_spill]]  ;;  %s102_s6 = sadd.s32 1, %s2674_s23 }
  0xa9   : > { %2195 = dma.hbm_to_vmem [thread:$0]  (!%p3040_p11), %s3036_s24, 1024, %s3044_s2, %s258_s5, %s3598_s18, %s3598_s18, %s3597_s14  }
  0xaa   : > { %p3614_p9 = scmp.eq.s32.totalorder %s2896_s7, 0  ;;  %p109_p7 = scmp.ne.s32.totalorder %s2674_s23, %s2670_s22 }
  0xab   : > { %s303_s19 = sand.u32 1, %s2674_s23   ;;  %s1936_s4 = sshll.u32 %s2710_s8, 10 }
  0xac   : > { %s3081_s3 = scalar_select %p3614_p9, %s2674_s23, %s102_s6  }
  0xad   : > { %p3615_p1 = scmp.eq.s32.totalorder %s2718_s10, 0  ;;  %p3616_p13 = scmp.eq.s32.totalorder %s2842_s11, 0 }
  0xae   : > { %p115_p0 = scmp.ne.s32.totalorder %s2670_s22, %s3613_s13  ;;  %s1821_s17 = sshll.u32 %s303_s19, 6 }
  0xaf   : > { %p111_p6 = por %p109_p7, %p3615_p1  ;;  %s3618_s30 = sld [smem:[#allocation36_spill]] }
  0xb0   : > { %p3093_p2 = por %p115_p0, %p3616_p13  ;;  %p3620_p12 = scmp.lt.s32.totalorder %s2718_s10, 4 }
  0xb1   : > { %s305_s2 = scalar_lea.vmem [#allocation8], %s1821_s17 }
  0xb2   : > { %s3617_s15 = scalar_select %p3093_p2, 1, 0 }
  0xb3   : > { %p3104_p4 = pnand %p3620_p12, %p111_p6  ;;  %s312_s24 = sshll.u32 %s305_s2, 4  ;;  %s3108_s24 = int_to_ptr.vmem [resolvable:$true] %s312_s24 }
  0xb5   : > { %s3619_s16 = smov %s3618_s30  ;;  %s3100_s5 = scalar_lea.hbm %s3618_s30, %s1936_s4 }
  0xb6   : > { %s2492_s13 = scalar_lea.hbm %s3100_s5, 1024  ;;  %p2494_p5 = pneg %p3104_p4 }
  0xb7   : > { %p2493_p10 = scmp.ne.s32.totalorder %s3100_s5, %s2492_s13  ;;  %s2497_s6 = scalar_lea.hbm %s3619_s16, 2048 }
  0xb8   : > { %p2498_p0 = scmp.lt.u32.totalorder %s3100_s5, %s3619_s16  ;;  %p2499_p1 = scmp.lt.u32.totalorder %s2497_s6, %s2492_s13 }
  0xb9   : > { %p2495_p9 = pnand %p2494_p5, %p2493_p10  ;;  %p2501_p13 = scmp.lt.u32.totalorder %s2492_s13, %s3100_s5 }
  0xba   : > { %p2500_p6 = por %p2499_p1, %p2498_p0 }
  0xbb   : > { %p2496_p7 = pneg %p2495_p9 }
  0xbc   : > { %p2502_p12 = por %p2501_p13, %p2500_p6 }
  0xbe   : > { %p2503_p8 = pnand %p2502_p12, %p2496_p7 }
  0xc0   : > { %2506 = shalt.err (!%p2503_p8)
}
  0xc1   : > { %s2507_s17 = scalar_lea.vmem %s3108_s24, 1024  ;;  %s2727_s29 = smov [#allocation8]  }
  0xc2   : > { %p2508_p10 = scmp.ne.s32.totalorder %s3108_s24, %s2507_s17  ;;  %s2512_s2 = sshll.u32 %s2727_s29, 4  ;;  %s2513_s2 = int_to_ptr.vmem [resolvable:$false] %s2512_s2 }
  0xc3   : > { %s2514_s0 = scalar_lea.vmem %s2513_s2, 2048  ;;  %p2515_p3 = scmp.lt.s32.totalorder %s3108_s24, %s2513_s2 }
  0xc4   : > { %p2510_p9 = pnand %p2508_p10, %p2494_p5  ;;  %p2516_p0 = scmp.lt.s32.totalorder %s2514_s0, %s2507_s17 }
  0xc6   : > { %p2511_p2 = pneg %p2510_p9  ;;  %p2517_p1 = por %p2516_p0, %p2515_p3 }
  0xc8   : > { %p2518_p6 = pnand %p2517_p1, %p2511_p2 }
  0xca   : > { %2521 = shalt.err (!%p2518_p6)
}
  0xcb   : > { %2201 = dma.hbm_to_vmem [thread:$0]  (!%p3104_p4), %s3100_s5, 1024, %s3108_s24, %s2948_s20, %s3598_s18, %s3598_s18, %s3597_s14  }
  0xcc   : > { %s1824_s13 = sshll.u32 %s3025_s12, 7  ;;  %s1937_s30 = sshll.u32 %s2714_s9, 11 }
  0xcd   : > { %s3622_s4 = sld [smem:[#allocation37_spill]]  ;;  %s326_s7 = scalar_lea.vmem [#allocation9], %s1824_s13 }
  0xce   : > { %s333_s29 = sshll.u32 %s326_s7, 4  ;;  %s3623_s2 = sand.u32 1, %s2718_s10   ;;  %s3146_s29 = int_to_ptr.vmem [resolvable:$true] %s333_s29 }
  0xcf   : > { %s3150_s0 = scalar_lea.sflag [#allocation10], %s3623_s2  ;;  %p3624_p8 = pneg %p3040_p11 }
  0xd3   : > { %s3144_s17 = scalar_lea.hbm %s3622_s4, %s1937_s30  ;;  %s2527_s18 = scalar_lea.hbm %s3622_s4, 4096 }
  0xd4   : > { %s2522_s16 = scalar_lea.hbm %s3144_s17, 2048  ;;  %p2528_p5 = scmp.lt.u32.totalorder %s3144_s17, %s3622_s4 }
  0xd5   : > { %p2523_p3 = scmp.ne.s32.totalorder %s3144_s17, %s2522_s16  ;;  %p2529_p7 = scmp.lt.u32.totalorder %s2527_s18, %s2522_s16 }
  0xd6   : > { %p2531_p12 = scmp.lt.u32.totalorder %s2522_s16, %s3144_s17 }
  0xd7   : > { %p2525_p2 = pnand %p2523_p3, %p3624_p8  ;;  %p2530_p13 = por %p2529_p7, %p2528_p5 }
  0xd9   : > { %p2526_p4 = pneg %p2525_p2  ;;  %p2532_p10 = por %p2531_p12, %p2530_p13 }
  0xdb   : > { %p2533_p9 = pnand %p2532_p10, %p2526_p4 }
  0xdd   : > { %2536 = shalt.err (!%p2533_p9)
}
  0xde   : > { %s2537_s24 = scalar_lea.vmem %s3146_s29, 2048  ;;  %p3625_p1 = pmov %p3624_p8 }
  0xdf   : > { %p2538_p0 = scmp.ne.s32.totalorder %s3146_s29, %s2537_s24  ;;  %s2728_s13 = smov [#allocation9]  }
  0xe0   : > { %s2542_s30 = sshll.u32 %s2728_s13, 4  ;;  %s2543_s30 = int_to_ptr.vmem [resolvable:$false] %s2542_s30 }
  0xe1   : > { %p2540_p6 = pnand %p2538_p0, %p3625_p1  ;;  %s2544_s6 = scalar_lea.vmem %s2543_s30, 4096 }
  0xe2   : > { %p2545_p8 = scmp.lt.s32.totalorder %s3146_s29, %s2543_s30  ;;  %p2546_p2 = scmp.lt.s32.totalorder %s2544_s6, %s2537_s24 }
  0xe3   : > { %p2541_p3 = pneg %p2540_p6 }
  0xe4   : > { %p2547_p5 = por %p2546_p2, %p2545_p8 }
  0xe6   : > { %p2548_p7 = pnand %p2547_p5, %p2541_p3 }
  0xe8   : > { %2551 = shalt.err (!%p2548_p7)
}
  0xe9   : > { %s2729_s16 = smov 8   ;;  %s3626_s19 = smov 128  }
  0xea   : > { %2204 = dma.hbm_to_vmem [thread:$0]  (!%p3040_p11), %s3144_s17, 2048, %s3146_s29, %s3150_s0, %s3626_s19, %s3626_s19, %s2729_s16  }
  0xeb   : > { %s3627_s7 = sld [smem:[#allocation27_spill]] }
  0xf1   : > { %p3628_p4 = scmp.ne.s32.totalorder %s3627_s7, 0 }
  0xf2   : > { %s3181_s2 = sand.u32 (!%p3628_p4), 1, %s2694_s28   ;;  %p3629_p13 = scmp.ne.s32.totalorder (!%p3628_p4), %s3605_s25, 0 }
  0xf3   : > { %345 = sbr.rel (%p3628_p4) target bundleno = 1184 (0x4a0), region = 44  ;;  %s1828_s20 = sshll.u32 (!%p3628_p4), %s3181_s2, 6 }
  0xf4   : > { %s348_s14 = scalar_lea.sflag (!%p3628_p4), [#allocation4], %s3181_s2  ;;  %s3185_s18 = scalar_lea.vmem (!%p3628_p4), [#allocation3], %s1828_s20 }
  0xfa   : > { %2637 = dma.done.wait (%p3629_p13), %s348_s14, 1024  }
  0xfb   : > { %2639 = vsyncadd (%p3629_p13), %s348_s14, 4294966272  ;;  %s3630_s1 = sld [smem:[#allocation23_spill]]  ;;  %s3631_s17 = sld [smem:[#allocation30_spill]] }
  0xfc   : > { %s356_s29 = sand.u32 1, %s2842_s11  }
  0xfd   : > { %s357_s5 = scalar_lea.sflag [#allocation7], %s356_s29 }
 0x101   : > { %s358_s0 = sand.u32 1, %s3630_s1   ;;  %p3632_p11 = scmp.ne.s32.totalorder %s3631_s17, 0 }
 0x102   : > { %s1829_s12 = sshll.u32 %s358_s0, 6 }
 0x103   : > { %s3193_s24 = scalar_lea.vmem [#allocation6], %s1829_s12 }
 0x104   : > { %2641 = dma.done.wait (%p3632_p11), %s357_s5, 1024  }
 0x105   : > { %2643 = vsyncadd (%p3632_p11), %s357_s5, 4294966272  ;;  %s367_s13 = sand.u32 1, %s2670_s22   ;;  %p3633_p12 = scmp.ne.s32.totalorder %s3617_s15, 0 }
 0x106   : > { %s1830_s30 = sshll.u32 %s367_s13, 6 }
 0x107   : > { %s3200_s6 = scalar_lea.vmem [#allocation8], %s1830_s30 }
 0x108   : > { %2645 = dma.done.wait (%p3633_p12), %s357_s5, 1024  }
 0x109   : > { %2647 = vsyncadd (%p3633_p12), %s357_s5, 4294966272  ;;  %s1831_s16 = sshll.u32 %s3181_s2, 7  ;;  %s375_s19 = scalar_lea.sflag [#allocation10], %s356_s29 }
 0x10a   : > { %s3207_s7 = scalar_lea.vmem [#allocation9], %s1831_s16 }
 0x10b   : > { %2649 = dma.done.wait (%p3629_p13), %s375_s19, 2048  }
 0x10c   : > { %2651 = vsyncadd (%p3629_p13), %s375_s19, 4294965248  ;;  %p3634_p10 = scmp.eq.s32.totalorder %s2842_s11, 0 }
 0x10e   : > { %2653 = dma.done.wait (%p3634_p10), [#allocation10], 1536   ;;  %p3635_p9 = pmov %p3634_p10 }
 0x110   : > { %2655 = vsyncadd (%p3635_p9), [#allocation10], 4294965760  ;;  %p3636_p0 = pmov %p3635_p9 }
 0x112   : > { %2657 = dma.done.wait (%p3636_p0), [#allocation13], 32   ;;  %p3637_p1 = pmov %p3636_p0 }
 0x113   : > { %s3221_s15 = scalar_lea.vmem [#allocation14], %s1828_s20  ;;  %s3638_s14 = sld [smem:[#allocation25_spill]] }
 0x114   : > { %2659 = vsyncadd (%p3637_p1), [#allocation13], 4294967264 }
 0x119   : > { %p1835_p6 = scmp.ne.s32.totalorder %s3638_s14, 0 }
 0x11a   : > { %vm440_vm0 = vcmask (!%p1835_p6), 523264   ;;  %v2730_v0 = vmov (!%p1835_p6), 0.0  }
 0x11b   : > { %439 = sbr.rel (%p1835_p6) target bundleno = 291 (0x123), region = 72  ;;  %441 = vst.msk [vmem:[#allocation2] sm:$0xff] (!%p1835_p6), %vm440_vm0, %v2730_v0  ;;  %442 = vst.msk [vmem:[#allocation2 + $0x8] sm:$0xff] (!%p1835_p6), %vm440_vm0, %v2730_v0 }
 0x11c   : > { %443 = vst.msk [vmem:[#allocation2 + $0x10] sm:$0xff] (!%p1835_p6), %vm440_vm0, %v2730_v0  ;;  %444 = vst.msk [vmem:[#allocation2 + $0x18] sm:$0xff] (!%p1835_p6), %vm440_vm0, %v2730_v0 }
 0x11d   : > { %445 = vst.msk [vmem:[#allocation2 + $0x20] sm:$0xff] (!%p1835_p6), %vm440_vm0, %v2730_v0  ;;  %446 = vst.msk [vmem:[#allocation2 + $0x28] sm:$0xff] (!%p1835_p6), %vm440_vm0, %v2730_v0 }
 0x11e   : > { %447 = vst.msk [vmem:[#allocation2 + $0x30] sm:$0xff] (!%p1835_p6), %vm440_vm0, %v2730_v0  ;;  %448 = vst.msk [vmem:[#allocation2 + $0x38] sm:$0xff] (!%p1835_p6), %vm440_vm0, %v2730_v0 }
 0x11f   : > { %449 = vst.msk [vmem:[#allocation2 + $0x40] sm:$0xff] (!%p1835_p6), %vm440_vm0, %v2730_v0  ;;  %450 = vst.msk [vmem:[#allocation2 + $0x48] sm:$0xff] (!%p1835_p6), %vm440_vm0, %v2730_v0 }
 0x120   : > { %451 = vst.msk [vmem:[#allocation2 + $0x50] sm:$0xff] (!%p1835_p6), %vm440_vm0, %v2730_v0  ;;  %452 = vst.msk [vmem:[#allocation2 + $0x58] sm:$0xff] (!%p1835_p6), %vm440_vm0, %v2730_v0 }
 0x121   : > { %453 = vst.msk [vmem:[#allocation2 + $0x60] sm:$0xff] (!%p1835_p6), %vm440_vm0, %v2730_v0  ;;  %454 = vst.msk [vmem:[#allocation2 + $0x68] sm:$0xff] (!%p1835_p6), %vm440_vm0, %v2730_v0 }
 0x122   : > { %455 = vst.msk [vmem:[#allocation2 + $0x70] sm:$0xff] %vm440_vm0, %v2730_v0  ;;  %456 = vst.msk [vmem:[#allocation2 + $0x78] sm:$0xff] %vm440_vm0, %v2730_v0 }
 0x123 PF: > { %v2338_v1 = vld [vmem:[%s3200_s6] sm:$0xff]   ;;  %v2339_v2 = vld [vmem:[%s3200_s6 + $0x8] sm:$0xff]   ;;  %v2340_v3 = vld [vmem:[%s3200_s6 + $0x10] sm:$0xff]   ;;  %vm714_vm1 = vcmask 523264   ;;  %s3639_s11 = sld [smem:[#allocation25_spill]] }
 0x124   : > { %2023 = vmatprep.subr.bf16.mxu0 %v2338_v1  ;;  %2127 = vmatprep.subr.bf16.mxu1 %v2338_v1  ;;  %v2341_v4 = vld [vmem:[%s3200_s6 + $0x18] sm:$0xff]   ;;  %v2346_v5 = vld [vmem:[%s3193_s24] sm:$0xff]   ;;  %v2343_v8 = vld [vmem:[%s3200_s6 + $0x28] sm:$0xff]  }
 0x125   : > { %2024 = vmatpush3.bf16.msra.mxu0 %v2338_v1  ;;  %2135 = vmatpush3.bf16.msra.mxu1 %v2338_v1  ;;  %v2347_v6 = vld [vmem:[%s3193_s24 + $0x20] sm:$0xff]   ;;  %v2344_v9 = vld [vmem:[%s3200_s6 + $0x30] sm:$0xff]   ;;  %v2345_v10 = vld [vmem:[%s3200_s6 + $0x38] sm:$0xff]  }
 0x126   : > { %2025 = vmatprep.subr.bf16.mxu0 %v2339_v2  ;;  %2128 = vmatprep.subr.bf16.mxu1 %v2339_v2  ;;  %v2342_v7 = vld [vmem:[%s3200_s6 + $0x20] sm:$0xff]   ;;  %v2348_v11 = vld [vmem:[%s3193_s24 + $0x8] sm:$0xff]   ;;  %v2350_v13 = vld [vmem:[%s3193_s24 + $0x10] sm:$0xff]  }
 0x127   : > { %2039 = vmatprep.mubr.bf16.mxu0 %v2346_v5  ;;  %2047 = vmatprep.mubr.bf16.mxu1 %v2347_v6  ;;  %v2349_v12 = vld [vmem:[%s3193_s24 + $0x28] sm:$0xff]   ;;  %v2351_v14 = vld [vmem:[%s3193_s24 + $0x30] sm:$0xff]   ;;  %v2352_v15 = vld [vmem:[%s3193_s24 + $0x18] sm:$0xff]  }
 0x128   : > { %v2353_v16 = vld [vmem:[%s3193_s24 + $0x38] sm:$0xff]   ;;  %v459_v17 = vld [vmem:[#allocation2 + $0x10] sm:$0xff]  ;;  %v457_v19 = vld [vmem:[#allocation2] sm:$0xff] }
 0x129   : > { %2026 = vmatpush3.bf16.msra.mxu0 %v2339_v2  ;;  %2136 = vmatpush3.bf16.msra.mxu1 %v2339_v2  ;;  %v467_v18 = vld [vmem:[#allocation2 + $0x50] sm:$0xff]  ;;  %v465_v20 = vld [vmem:[#allocation2 + $0x40] sm:$0xff]  ;;  %v460_v23 = vld [vmem:[#allocation2 + $0x18] sm:$0xff]  ;;  %p1852_p3 = scmp.ne.s32.totalorder %s3639_s11, 1 }
 0x12a   : > { %2027 = vmatprep.subr.bf16.mxu0 %v2340_v3  ;;  %2129 = vmatprep.subr.bf16.mxu1 %v2340_v3  ;;  %v468_v24 = vld [vmem:[#allocation2 + $0x58] sm:$0xff]  ;;  %v458_v29 = vld [vmem:[#allocation2 + $0x8] sm:$0xff]  ;;  %v463_v41 = vld [vmem:[#allocation2 + $0x30] sm:$0xff]  ;;  %vm1493_vm2 = vcmask (!%p1852_p3), 519168   ;;  %s2732_s25 = smov (!%p1852_p3), 64   ;;  %vm1606_vm3 = vcmask (!%p1852_p3), 1043968  }
 0x12b   : > { %v466_v30 = vld [vmem:[#allocation2 + $0x48] sm:$0xff]  ;;  %v471_v42 = vld [vmem:[#allocation2 + $0x70] sm:$0xff]  ;;  %v461_v43 = vld [vmem:[#allocation2 + $0x20] sm:$0xff] }
 0x12c   : > { %v469_v44 = vld [vmem:[#allocation2 + $0x60] sm:$0xff]  ;;  %v464_v47 = vld [vmem:[#allocation2 + $0x38] sm:$0xff]  ;;  %v462_v53 = vld [vmem:[#allocation2 + $0x28] sm:$0xff] }
 0x12d   : > { %2028 = vmatpush3.bf16.msra.mxu0 %v2340_v3  ;;  %2137 = vmatpush3.bf16.msra.mxu1 %v2340_v3  ;;  %v472_v48 = vld [vmem:[#allocation2 + $0x78] sm:$0xff]  ;;  %v470_v54 = vld [vmem:[#allocation2 + $0x68] sm:$0xff]  ;;  %v2356_v1 = vld [vmem:[#allocation11] sm:$0xff] (!%p1852_p3)   ;;  %v2731_v3 = vmov (!%p1852_p3), 0  }
 0x12e   : > { %2029 = vmatprep.subr.bf16.mxu0 %v2341_v4  ;;  %2130 = vmatprep.subr.bf16.mxu1 %v2341_v4  ;;  %v2357_v2 = vld [vmem:[#allocation11 + $0x8] sm:$0xff] (!%p1852_p3)   ;;  %v2360_v5 = vld [vmem:[%s3185_s18] sm:$0xff] (!%p1852_p3)   ;;  %v2359_v6 = vld [vmem:[#allocation11 + $0x18] sm:$0xff] (!%p1852_p3)  }
 0x12f   : > { %2355 = vset.pattern.permute.xlu1 (!%p1852_p3), %v2731_v3  ;;  %2354 = vset.pattern.permute.xlu0 (!%p1852_p3), %v2731_v3 }
 0x131   : > { %2030 = vmatpush3.bf16.msra.mxu0 %v2341_v4  ;;  %2138 = vmatpush3.bf16.msra.mxu1 %v2341_v4  ;;  %v2358_v4 = vld [vmem:[#allocation11 + $0x10] sm:$0xff] (!%p1852_p3)  }
 0x132   : > { %2031 = vmatprep.subr.bf16.mxu0 %v2342_v7  ;;  %2131 = vmatprep.subr.bf16.mxu1 %v2342_v7 }
 0x135   : > { %2032 = vmatpush3.bf16.msra.mxu0 %v2342_v7  ;;  %2139 = vmatpush3.bf16.msra.mxu1 %v2342_v7  ;;  %v754_v7 = vld [vmem:[%s3207_s7 + $0x10] sm:$0xff] (!%p1852_p3) }
 0x136   : > { %2033 = vmatprep.subr.bf16.mxu0 %v2343_v8  ;;  %2132 = vmatprep.subr.bf16.mxu1 %v2343_v8 }
 0x137   : > { %780 = vperm.xlu1 (!%p1852_p3), %2355, %v754_v7  }
 0x139   : > { %2034 = vmatpush3.bf16.msra.mxu0 %v2343_v8  ;;  %2140 = vmatpush3.bf16.msra.mxu1 %v2343_v8  ;;  %v752_v8 = vld [vmem:[%s3207_s7] sm:$0xff] (!%p1852_p3) }
 0x13a   : > { %2035 = vmatprep.subr.bf16.mxu0 %v2344_v9  ;;  %2133 = vmatprep.subr.bf16.mxu1 %v2344_v9 }
 0x13b   : > { %770 = vperm.xlu0 (!%p1852_p3), %2354, %v752_v8  }
 0x13d   : > { %2036 = vmatpush3.bf16.msra.mxu0 %v2344_v9  ;;  %2141 = vmatpush3.bf16.msra.mxu1 %v2344_v9  ;;  %v2361_v9 = vld [vmem:[%s3185_s18 + $0x8] sm:$0xff] (!%p1852_p3)  }
 0x13e   : > { %2037 = vmatprep.subr.bf16.mxu0 %v2345_v10  ;;  %2134 = vmatprep.subr.bf16.mxu1 %v2345_v10 }
 0x141   : > { %2038 = vmatpush3.bf16.msra.mxu0 %v2345_v10  ;;  %2142 = vmatpush3.bf16.msra.mxu1 %v2345_v10  ;;  %v755_v10 = vld [vmem:[%s3207_s7 + $0x18] sm:$0xff] (!%p1852_p3) }
 0x142   : > { %2055 = vmatprep.subr.bf16.mxu0 (!%p1852_p3), %v2356_v1  ;;  %785 = vperm.xlu1 (!%p1852_p3), %2355, %v755_v10  }
 0x144   : > { %2040 = vmatmul.mubr.bf16.vlgmr.msra.gmra.mrb[0].mxu0 %v2348_v11  ;;  %2048 = vmatmul.mubr.bf16.vlgmr.msra.gmra.mrb[0].mxu1 %v2349_v12  ;;  %v753_v11 = vld [vmem:[%s3207_s7 + $0x8] sm:$0xff] (!%p1852_p3)  ;;  %v2362_v12 = vld [vmem:[%s3185_s18 + $0x10] sm:$0xff] (!%p1852_p3)  }
 0x145   : > { %2043 = vmatprep.mubr.bf16.mxu0 %v2350_v13  ;;  %2051 = vmatprep.mubr.bf16.mxu1 %v2351_v14  ;;  %v757_v13 = vld [vmem:[%s3207_s7 + $0x28] sm:$0xff] (!%p1852_p3)  ;;  %v756_v14 = vld [vmem:[%s3207_s7 + $0x20] sm:$0xff] (!%p1852_p3) }
 0x146   : > { %2056 = vmatpush3.bf16.msra.mxu0 (!%p1852_p3), %v2356_v1  ;;  %775 = vperm.xlu0 (!%p1852_p3), %2354, %v753_v11  }
 0x147   : > { %2057 = vmatprep.subr.bf16.mxu0 (!%p1852_p3), %v2357_v2  ;;  %795 = vperm.xlu1 (!%p1852_p3), %2355, %v757_v13  }
 0x14a   : > { %2058 = vmatpush3.bf16.msra.mxu0 (!%p1852_p3), %v2357_v2  ;;  %790 = vperm.xlu0 (!%p1852_p3), %2354, %v756_v14  }
 0x14b   : > { %2059 = vmatprep.subr.bf16.mxu0 (!%p1852_p3), %v2358_v4 }
 0x14c   : > { %2044 = vmatmul.mubr.bf16.gmra.mrb[4].mxu0 %v2352_v15  ;;  %2052 = vmatmul.mubr.bf16.gmra.mrb[4].mxu1 %v2353_v16  ;;  %v2368_v15 = vld [vmem:[#allocation11 + $0x40] sm:$0xff] (!%p1852_p3)   ;;  %v2369_v16 = vld [vmem:[#allocation11 + $0x48] sm:$0xff] (!%p1852_p3)  }
 0x14d   : > { %2063 = vmatprep.mubr.msk.bf16.mxu0 (!%p1852_p3), %vm714_vm1, %v2360_v5  ;;  %2143 = vmatprep.subr.bf16.mxu1 (!%p1852_p3), %v2368_v15 }
 0x14e   : > { %2060 = vmatpush3.bf16.msra.mxu0 (!%p1852_p3), %v2358_v4  ;;  %2147 = vmatpush3.bf16.msra.mxu1 (!%p1852_p3), %v2368_v15 }
 0x14f   : > { %2061 = vmatprep.subr.bf16.mxu0 (!%p1852_p3), %v2359_v6  ;;  %2144 = vmatprep.subr.bf16.mxu1 (!%p1852_p3), %v2369_v16 }
 0x152   : > { %2062 = vmatpush3.bf16.msra.mxu0 (!%p1852_p3), %v2359_v6  ;;  %2148 = vmatpush3.bf16.msra.mxu1 (!%p1852_p3), %v2369_v16 }
 0x153   : > { %2079 = vmatprep.subr.bf16.mxu0 (!%p1852_p3), %v2368_v15 }
 0x1ba   : > { %v771_v3 = vpop.permute.xlu0 (!%p1852_p3), %770 }
 0x217   : > { %v2041_v21 = vpop.f32.mrb[0].mxu0  ;;  %v2049_v22 = vpop.f32.mrb[0].mxu1 }
 0x218   : > { %v700_v25 = vadd.f32 %v2041_v21, %v459_v17  ;;  %v708_v26 = vadd.f32 %v2049_v22, %v467_v18  ;;  %v635_v27 = vpop.f32.mrb[1].mxu0  ;;  %v667_v28 = vpop.f32.mrb[1].mxu1  ;;  %v2363_v17 = vld [vmem:[%s3185_s18 + $0x18] sm:$0xff] (!%p1852_p3)   ;;  %v761_v21 = vld [vmem:[%s3207_s7 + $0x48] sm:$0xff] (!%p1852_p3)  ;;  %v760_v22 = vld [vmem:[%s3207_s7 + $0x40] sm:$0xff] (!%p1852_p3) }
 0x219   : > { %v698_v31 = vadd.f32 %v635_v27, %v457_v19  ;;  %v706_v32 = vadd.f32 %v667_v28, %v465_v20  ;;  %v2042_v33 = vpop.f32.mrb[2].mxu0  ;;  %v2050_v34 = vpop.f32.mrb[2].mxu1  ;;  %v759_v18 = vld [vmem:[%s3207_s7 + $0x38] sm:$0xff] (!%p1852_p3)  ;;  %v758_v19 = vld [vmem:[%s3207_s7 + $0x30] sm:$0xff] (!%p1852_p3)  ;;  %v2364_v20 = vld [vmem:[%s3185_s18 + $0x20] sm:$0xff] (!%p1852_p3)  }
 0x21a   : > { %717 = vst.msk [vmem:[#allocation2 + $0x10] sm:$0xff] %vm714_vm1, %v700_v25  ;;  %725 = vst.msk [vmem:[#allocation2 + $0x50] sm:$0xff] %vm714_vm1, %v708_v26  ;;  %v701_v35 = vadd.f32 %v2042_v33, %v460_v23  ;;  %v709_v36 = vadd.f32 %v2050_v34, %v468_v24  ;;  %v638_v37 = vpop.f32.mrb[3].mxu0  ;;  %v670_v38 = vpop.f32.mrb[3].mxu1  ;;  %2064 = vmatmul.mubr.msk.bf16.vlgmr.msra.gmra.mrb[0].mxu0 (!%p1852_p3), %vm714_vm1, %v2361_v9  ;;  %805 = vperm.xlu1 (!%p1852_p3), %2355, %v759_v18   ;;  %v2365_v23 = vld [vmem:[%s3185_s18 + $0x28] sm:$0xff] (!%p1852_p3)   ;;  %v763_v24 = vld [vmem:[%s3207_s7 + $0x58] sm:$0xff] (!%p1852_p3) }
 0x21b   : > { %715 = vst.msk [vmem:[#allocation2] sm:$0xff] %vm714_vm1, %v698_v31  ;;  %723 = vst.msk [vmem:[#allocation2 + $0x40] sm:$0xff] %vm714_vm1, %v706_v32  ;;  %v699_v39 = vadd.f32 %v638_v37, %v458_v29  ;;  %v707_v40 = vadd.f32 %v670_v38, %v466_v30  ;;  %2067 = vmatprep.mubr.msk.bf16.mxu0 (!%p1852_p3), %vm714_vm1, %v2362_v12  ;;  %2080 = vmatpush3.bf16.msra.mxu0 (!%p1852_p3), %v2368_v15  ;;  %v762_v25 = vld [vmem:[%s3207_s7 + $0x50] sm:$0xff] (!%p1852_p3)  ;;  %v765_v27 = vld [vmem:[%s3207_s7 + $0x68] sm:$0xff] (!%p1852_p3)  ;;  %v776_v15 = vpop.permute.xlu0 (!%p1852_p3), %775 }
 0x21c   : > { %718 = vst.msk [vmem:[#allocation2 + $0x18] sm:$0xff] %vm714_vm1, %v701_v35  ;;  %726 = vst.msk [vmem:[#allocation2 + $0x58] sm:$0xff] %vm714_vm1, %v709_v36  ;;  %2081 = vmatprep.subr.bf16.mxu0 (!%p1852_p3), %v2369_v16  ;;  %800 = vperm.xlu0 (!%p1852_p3), %2354, %v758_v19   ;;  %v2366_v26 = vld [vmem:[%s3185_s18 + $0x30] sm:$0xff] (!%p1852_p3)   ;;  %v764_v28 = vld [vmem:[%s3207_s7 + $0x60] sm:$0xff] (!%p1852_p3)  ;;  %v896_v35 = vlaneseq (!%p1852_p3) }
 0x21d   : > { %716 = vst.msk [vmem:[#allocation2 + $0x8] sm:$0xff] %vm714_vm1, %v699_v39  ;;  %724 = vst.msk [vmem:[#allocation2 + $0x48] sm:$0xff] %vm714_vm1, %v707_v40  ;;  %v2367_v29 = vld [vmem:[%s3185_s18 + $0x38] sm:$0xff] (!%p1852_p3)   ;;  %v766_v31 = vld [vmem:[%s3207_s7 + $0x70] sm:$0xff] (!%p1852_p3) }
 0x21e   : > { %815 = vperm.xlu1 (!%p1852_p3), %2355, %v761_v21   ;;  %v767_v30 = vld [vmem:[%s3207_s7 + $0x78] sm:$0xff] (!%p1852_p3)  ;;  %v2370_v32 = vld [vmem:[#allocation11 + $0x50] sm:$0xff] (!%p1852_p3)   ;;  %v3305_v34 = vld [vmem:[#allocation11 + $0x20] sm:$0xff] (!%p1852_p3)   ;;  %v3308_v36 = vshrl.u32 (!%p1852_p3), %v896_v35, 7 }
 0x21f   : > { %v2045_v45 = vpop.f32.mrb[4].mxu0  ;;  %v2053_v46 = vpop.f32.mrb[4].mxu1  ;;  %734 = sbr.rel (%p1852_p3) target bundleno = 1156 (0x484), region = 76  ;;  %2082 = vmatpush3.bf16.msra.mxu0 (!%p1852_p3), %v2369_v16  ;;  %2145 = vmatprep.subr.bf16.mxu1 (!%p1852_p3), %v2370_v32  ;;  %v2371_v33 = vld [vmem:[#allocation11 + $0x58] sm:$0xff] (!%p1852_p3)   ;;  %v3311_v38 = vld [vmem:[#allocation12] sm:$0x3] (!%p1852_p3) }
 0x220   : > { %v704_v49 = vadd.f32 %v2045_v45, %v463_v41  ;;  %v712_v50 = vadd.f32 %v2053_v46, %v471_v42  ;;  %v651_v51 = vpop.f32.mrb[5].mxu0  ;;  %v683_v52 = vpop.f32.mrb[5].mxu1  ;;  %810 = vperm.xlu0 (!%p1852_p3), %2354, %v760_v22   ;;  %2083 = vmatprep.subr.bf16.mxu0 (!%p1852_p3), %v2370_v32  ;;  %v898_v37 = vsub.s32 (!%p1852_p3), 0, %v3308_v36 }
 0x221   : > { %v702_v55 = vadd.f32 %v651_v51, %v461_v43  ;;  %v710_v56 = vadd.f32 %v683_v52, %v469_v44  ;;  %v2046_v57 = vpop.f32.mrb[6].mxu0  ;;  %v2054_v58 = vpop.f32.mrb[6].mxu1  ;;  %2149 = vmatpush3.bf16.msra.mxu1 (!%p1852_p3), %v2370_v32 }
 0x222   : > { %721 = vst.msk [vmem:[#allocation2 + $0x30] sm:$0xff] %vm714_vm1, %v704_v49  ;;  %729 = vst.msk [vmem:[#allocation2 + $0x70] sm:$0xff] %vm714_vm1, %v712_v50  ;;  %v705_v59 = vadd.f32 %v2046_v57, %v464_v47  ;;  %v713_v60 = vadd.f32 %v2054_v58, %v472_v48  ;;  %v654_v61 = vpop.f32.mrb[7].mxu0  ;;  %v686_v62 = vpop.f32.mrb[7].mxu1  ;;  %2068 = vmatmul.mubr.msk.bf16.gmra.mrb[4].mxu0 (!%p1852_p3), %vm714_vm1, %v2363_v17  ;;  %825 = vperm.xlu1 (!%p1852_p3), %2355, %v763_v24   ;;  %v736_v22 = vld [vmem:[#allocation2] sm:$0xff] (!%p1852_p3)  ;;  %v2373_v24 = vld [vmem:[#allocation11 + $0x28] sm:$0xff] (!%p1852_p3)  }
 0x223   : > { %719 = vst.msk [vmem:[#allocation2 + $0x20] sm:$0xff] %vm714_vm1, %v702_v55  ;;  %727 = vst.msk [vmem:[#allocation2 + $0x60] sm:$0xff] %vm714_vm1, %v710_v56  ;;  %v703_v63 = vadd.f32 %v654_v61, %v462_v53  ;;  %v711_v0 = vadd.f32 %v686_v62, %v470_v54  ;;  %2071 = vmatprep.mubr.msk.bf16.mxu0 (!%p1852_p3), %vm714_vm1, %v2364_v20  ;;  %2084 = vmatpush3.bf16.msra.mxu0 (!%p1852_p3), %v2370_v32 }
 0x224   : > { %722 = vst.msk [vmem:[#allocation2 + $0x38] sm:$0xff] %vm714_vm1, %v705_v59  ;;  %730 = vst.msk [vmem:[#allocation2 + $0x78] sm:$0xff] %vm714_vm1, %v713_v60  ;;  %820 = vperm.xlu0 (!%p1852_p3), %2354, %v762_v25   ;;  %2085 = vmatprep.subr.bf16.mxu0 (!%p1852_p3), %v2371_v33  ;;  %v3314_v39 = vrot.slane (!%p1852_p3), %v3311_v38, %v898_v37 }
 0x225   : > { %720 = vst.msk [vmem:[#allocation2 + $0x28] sm:$0xff] %vm714_vm1, %v703_v63  ;;  %728 = vst.msk [vmem:[#allocation2 + $0x68] sm:$0xff] %vm714_vm1, %v711_v0  ;;  %2146 = vmatprep.subr.bf16.mxu1 (!%p1852_p3), %v2371_v33  ;;  %v3334_v0 = vpop.permute.xlu1 (!%p1852_p3), %780 }
 0x226   : > { %835 = vperm.xlu1 %2355, %v765_v27   ;;  %2150 = vmatpush3.bf16.msra.mxu1 %v2371_v33 }
 0x227   : > { %2086 = vmatpush3.bf16.msra.mxu0 %v2371_v33  ;;  %2103 = vmatprep.subr.bf16.mxu1 %v3305_v34 }
 0x228   : > { %830 = vperm.xlu0 %2354, %v764_v28  }
 0x229   : > { %v786_v11 = vpop.permute.xlu1 %785 }
 0x22a   : > { %2072 = vmatmul.mubr.msk.bf16.gmra.mrb[8].mxu0 %vm714_vm1, %v2365_v23  ;;  %845 = vperm.xlu1 %2355, %v767_v30   ;;  %v737_v23 = vld [vmem:[#allocation2 + $0x8] sm:$0xff] }
 0x22b   : > { %2075 = vmatprep.mubr.msk.bf16.mxu0 %vm714_vm1, %v2366_v26  ;;  %v849_v30 = vmul.f32 %v776_v15, %v737_v23  ;;  %v751_v23 = vld [vmem:[#allocation2 + $0x78] sm:$0xff] }
 0x22c   : > { %840 = vperm.xlu0 %2354, %v766_v31   ;;  %v791_v31 = vpop.permute.xlu0 %790 }
 0x22d   : > { %v796_v26 = vpop.permute.xlu1 %795 }
 0x232   : > { %2076 = vmatmul.mubr.msk.bf16.gmra.mrb[12].mxu0 %vm714_vm1, %v2367_v29  ;;  %v848_v29 = vmul.f32 %v771_v3, %v736_v22 }
 0x2ed   : > { %v2065_v40 = vpop.f32.mrb[0].mxu0 }
 0x2ee   : > { %v1031_v41 = vadd.f32 %v2065_v40, %v3314_v39  ;;  %v1022_v42 = vpop.f32.mrb[1].mxu0 }
 0x2ef   : > { %v1023_v43 = vadd.f32 %v1022_v42, %v3314_v39  ;;  %v2066_v44 = vpop.f32.mrb[2].mxu0 }
 0x2f0   : > { %v1940_v45 = vpack.c.bf16 %v1031_v41, %v1031_v41  ;;  %v1034_v46 = vadd.f32 %v2066_v44, %v3314_v39  ;;  %v1025_v47 = vpop.f32.mrb[3].mxu0 }
 0x2f1   : > { %v1938_v48 = vpack.c.bf16 %v1023_v43, %v1023_v43  ;;  %v1026_v49 = vadd.f32 %v1025_v47, %v3314_v39 }
 0x2f2   : > { %v1086_v50 = vpack.c.bf16 %v1034_v46, %v1031_v41  ;;  %v1941_v51 = vpack.c.bf16 %v1034_v46, %v1034_v46  ;;  %1496 = vst.msk [vmem:[%s3221_s15 + $0x8] sm:$0xf] %vm1493_vm2, %v1940_v45  ;;  %v2374_v41 = vld [vmem:[#allocation11 + $0x30] sm:$0xff]   ;;  %v864_v46 = vpack.c.bf16 %v849_v30, %v848_v29 }
 0x2f3   : > { %v1085_v52 = vpack.c.bf16 %v1026_v49, %v1023_v43  ;;  %v1939_v53 = vpack.c.bf16 %v1026_v49, %v1026_v49  ;;  %1494 = vst.msk [vmem:[%s3221_s15] sm:$0xf] %vm1493_vm2, %v1938_v48  ;;  %v2375_v48 = vld [vmem:[#allocation11 + $0x38] sm:$0xff]   ;;  %v738_v49 = vld [vmem:[#allocation2 + $0x10] sm:$0xff] }
 0x2f4   : > { %1497 = vst.msk [vmem:[%s3221_s15 + $0xc] sm:$0xf] %vm1493_vm2, %v1941_v51  ;;  %v806_v51 = vpop.permute.xlu1 %805 }
 0x2f5   : > { %v2069_v54 = vpop.f32.mrb[4].mxu0  ;;  %2087 = vmatprep.mubr.msk.bf16.mxu0 %vm714_vm1, %v1085_v52  ;;  %1495 = vst.msk [vmem:[%s3221_s15 + $0x4] sm:$0xf] %vm1493_vm2, %v1939_v53  ;;  %v801_v52 = vpop.permute.xlu0 %800  ;;  %v740_v53 = vld [vmem:[#allocation2 + $0x20] sm:$0xff] }
 0x2f6   : > { %v1047_v55 = vadd.f32 %v2069_v54, %v3314_v39  ;;  %v1038_v56 = vpop.f32.mrb[5].mxu0  ;;  %2088 = vmatmul.mubr.msk.bf16.vlgmr.msra.gmra.mrb[16].mxu0 %vm714_vm1, %v1086_v50  ;;  %v739_v50 = vld [vmem:[#allocation2 + $0x18] sm:$0xff]  ;;  %v850_v54 = vmul.f32 %v3334_v0, %v738_v49 }
 0x2f7   : > { %v1039_v57 = vadd.f32 %v1038_v56, %v3314_v39  ;;  %v2070_v58 = vpop.f32.mrb[6].mxu0 }
 0x2f8   : > { %v1944_v59 = vpack.c.bf16 %v1047_v55, %v1047_v55  ;;  %v1050_v60 = vadd.f32 %v2070_v58, %v3314_v39  ;;  %v1041_v61 = vpop.f32.mrb[7].mxu0  ;;  %v816_v58 = vpop.permute.xlu1 %815 }
 0x2f9   : > { %v1942_v62 = vpack.c.bf16 %v1039_v57, %v1039_v57  ;;  %v1042_v63 = vadd.f32 %v1041_v61, %v3314_v39 }
 0x2fa   : > { %v1088_v1 = vpack.c.bf16 %v1050_v60, %v1047_v55  ;;  %v1945_v2 = vpack.c.bf16 %v1050_v60, %v1050_v60  ;;  %1500 = vst.msk [vmem:[%s3221_s15 + $0x18] sm:$0xf] %vm1493_vm2, %v1944_v59  ;;  %v851_v55 = vmul.f32 %v786_v11, %v739_v50  ;;  %v811_v59 = vpop.permute.xlu0 %810  ;;  %v746_v11 = vld [vmem:[#allocation2 + $0x50] sm:$0xff] }
 0x2fb   : > { %v1087_v4 = vpack.c.bf16 %v1042_v63, %v1039_v57  ;;  %v1943_v5 = vpack.c.bf16 %v1042_v63, %v1042_v63  ;;  %1498 = vst.msk [vmem:[%s3221_s15 + $0x10] sm:$0xf] %vm1493_vm2, %v1942_v62  ;;  %v852_v57 = vmul.f32 %v791_v31, %v740_v53  ;;  %v743_v62 = vld [vmem:[#allocation2 + $0x38] sm:$0xff]  ;;  %v742_v63 = vld [vmem:[#allocation2 + $0x30] sm:$0xff] }
 0x2fc   : > { %1501 = vst.msk [vmem:[%s3221_s15 + $0x1c] sm:$0xf] %vm1493_vm2, %v1945_v2  ;;  %v865_v60 = vpack.c.bf16 %v851_v55, %v850_v54  ;;  %v744_v2 = vld [vmem:[#allocation2 + $0x40] sm:$0xff]  ;;  %v855_v3 = vmul.f32 %v806_v51, %v743_v62 }
 0x2fd   : > { %v2073_v6 = vpop.f32.mrb[8].mxu0  ;;  %2091 = vmatprep.mubr.msk.bf16.mxu0 %vm714_vm1, %v1087_v4  ;;  %1499 = vst.msk [vmem:[%s3221_s15 + $0x14] sm:$0xf] %vm1493_vm2, %v1943_v5  ;;  %v854_v4 = vmul.f32 %v801_v52, %v742_v63  ;;  %v856_v5 = vmul.f32 %v811_v59, %v744_v2 }
 0x2fe   : > { %v1063_v7 = vadd.f32 %v2073_v6, %v3314_v39  ;;  %v1054_v8 = vpop.f32.mrb[9].mxu0  ;;  %2092 = vmatmul.mubr.msk.bf16.gmra.mrb[20].mxu0 %vm714_vm1, %v1088_v1  ;;  %v745_v1 = vld [vmem:[#allocation2 + $0x48] sm:$0xff]  ;;  %v826_v6 = vpop.permute.xlu1 %825 }
 0x2ff   : > { %v1055_v9 = vadd.f32 %v1054_v8, %v3314_v39  ;;  %v2074_v10 = vpop.f32.mrb[10].mxu0  ;;  %v857_v0 = vmul.f32 %v816_v58, %v745_v1  ;;  %v867_v8 = vpack.c.bf16 %v855_v3, %v854_v4 }
 0x300   : > { %v1948_v12 = vpack.c.bf16 %v1063_v7, %v1063_v7  ;;  %v1066_v13 = vadd.f32 %v2074_v10, %v3314_v39  ;;  %v1057_v14 = vpop.f32.mrb[11].mxu0  ;;  %v747_v10 = vld [vmem:[#allocation2 + $0x58] sm:$0xff] }
 0x301   : > { %v1946_v16 = vpack.c.bf16 %v1055_v9, %v1055_v9  ;;  %v1058_v17 = vadd.f32 %v1057_v14, %v3314_v39 }
 0x302   : > { %v1090_v18 = vpack.c.bf16 %v1066_v13, %v1063_v7  ;;  %v1949_v19 = vpack.c.bf16 %v1066_v13, %v1066_v13  ;;  %1504 = vst.msk [vmem:[%s3221_s15 + $0x28] sm:$0xf] %vm1493_vm2, %v1948_v12  ;;  %v821_v7 = vpop.permute.xlu0 %820  ;;  %v749_v12 = vld [vmem:[#allocation2 + $0x68] sm:$0xff]  ;;  %v748_v13 = vld [vmem:[#allocation2 + $0x60] sm:$0xff]  ;;  %v836_v14 = vpop.permute.xlu1 %835 }
 0x303   : > { %v1947_v20 = vpack.c.bf16 %v1058_v17, %v1058_v17  ;;  %v1089_v21 = vpack.c.bf16 %v1058_v17, %v1055_v9  ;;  %1502 = vst.msk [vmem:[%s3221_s15 + $0x20] sm:$0xf] %vm1493_vm2, %v1946_v16  ;;  %v868_v9 = vpack.c.bf16 %v857_v0, %v856_v5  ;;  %v859_v16 = vmul.f32 %v826_v6, %v747_v10 }
 0x304   : > { %1505 = vst.msk [vmem:[%s3221_s15 + $0x2c] sm:$0xf] %vm1493_vm2, %v1949_v19  ;;  %v858_v17 = vmul.f32 %v821_v7, %v746_v11 }
 0x305   : > { %v2077_v25 = vpop.f32.mrb[12].mxu0  ;;  %2095 = vmatprep.mubr.msk.bf16.mxu1 %vm714_vm1, %v1089_v21  ;;  %1503 = vst.msk [vmem:[%s3221_s15 + $0x24] sm:$0xf] %vm1493_vm2, %v1947_v20 }
 0x306   : > { %v1079_v27 = vadd.f32 %v2077_v25, %v3314_v39  ;;  %v1070_v28 = vpop.f32.mrb[13].mxu0  ;;  %2096 = vmatmul.mubr.msk.bf16.vlgmr.msra.gmra.mrb[0].mxu1 %vm714_vm1, %v1090_v18  ;;  %v831_v15 = vpop.permute.xlu0 %830  ;;  %v861_v18 = vmul.f32 %v836_v14, %v749_v12  ;;  %v869_v20 = vpack.c.bf16 %v859_v16, %v858_v17  ;;  %v750_v25 = vld [vmem:[#allocation2 + $0x70] sm:$0xff] }
 0x307   : > { %v1071_v32 = vadd.f32 %v1070_v28, %v3314_v39  ;;  %2104 = vmatpush3.bf16.msra.mxu1 %v3305_v34  ;;  %v2078_v33 = vpop.f32.mrb[14].mxu0  ;;  %v860_v19 = vmul.f32 %v831_v15, %v748_v13  ;;  %v846_v22 = vpop.permute.xlu1 %845 }
 0x308   : > { %v1952_v35 = vpack.c.bf16 %v1079_v27, %v1079_v27  ;;  %v1082_v37 = vadd.f32 %v2078_v33, %v3314_v39  ;;  %v1073_v40 = vpop.f32.mrb[15].mxu0  ;;  %2105 = vmatprep.subr.bf16.mxu1 %v2373_v24 }
 0x309   : > { %v1950_v42 = vpack.c.bf16 %v1071_v32, %v1071_v32  ;;  %v1074_v43 = vadd.f32 %v1073_v40, %v3314_v39  ;;  %v741_v39 = vld [vmem:[#allocation2 + $0x28] sm:$0xff]  ;;  %v870_v21 = vpack.c.bf16 %v861_v18, %v860_v19 }
 0x30a   : > { %v1092_v44 = vpack.c.bf16 %v1082_v37, %v1079_v27  ;;  %v1953_v45 = vpack.c.bf16 %v1082_v37, %v1082_v37  ;;  %1508 = vst.msk [vmem:[%s3221_s15 + $0x38] sm:$0xf] %vm1493_vm2, %v1952_v35  ;;  %v853_v56 = vmul.f32 %v796_v26, %v741_v39  ;;  %v863_v26 = vmul.f32 %v846_v22, %v751_v23 }
 0x30b   : > { %v1091_v47 = vpack.c.bf16 %v1074_v43, %v1071_v32  ;;  %v1951_v34 = vpack.c.bf16 %v1074_v43, %v1074_v43  ;;  %2106 = vmatpush3.bf16.msra.mxu1 %v2373_v24  ;;  %1506 = vst.msk [vmem:[%s3221_s15 + $0x30] sm:$0xf] %vm1493_vm2, %v1950_v42  ;;  %v841_v24 = vpop.permute.xlu0 %840 }
 0x30c   : > { %2107 = vmatprep.subr.bf16.mxu1 %v2374_v41  ;;  %1509 = vst.msk [vmem:[%s3221_s15 + $0x3c] sm:$0xf] %vm1493_vm2, %v1953_v45  ;;  %v866_v61 = vpack.c.bf16 %v853_v56, %v852_v57  ;;  %v862_v27 = vmul.f32 %v841_v24, %v750_v25 }
 0x30d   : > { %2099 = vmatprep.mubr.msk.bf16.mxu1 %vm714_vm1, %v1091_v47  ;;  %1507 = vst.msk [vmem:[%s3221_s15 + $0x34] sm:$0xf] %vm1493_vm2, %v1951_v34 }
 0x30e   : > { %2100 = vmatmul.mubr.msk.bf16.gmra.mrb[4].mxu1 %vm714_vm1, %v1092_v44  ;;  %v871_v28 = vpack.c.bf16 %v863_v26, %v862_v27 }
 0x30f   : > { %2108 = vmatpush3.bf16.msra.mxu1 %v2374_v41  ;;  %2111 = vmatprep.mubr.msk.bf16.mxu1 %vm714_vm1, %v864_v46  ;;  %v1403_v41 = vsub.s32 1, %v3308_v36 }
 0x310   : > { %2109 = vmatprep.subr.bf16.mxu1 %v2375_v48 }
 0x311   : > { %v3386_v42 = vrot.slane %v3311_v38, %v1403_v41 }
 0x313   : > { %2110 = vmatpush3.bf16.msra.mxu1 %v2375_v48 }
 0x316   : > { %2112 = vmatmul.mubr.msk.bf16.vlgmr.msra.gmra.mrb[8].mxu1 %vm714_vm1, %v865_v60 }
 0x317   : > { %2115 = vmatprep.mubr.msk.bf16.mxu1 %vm714_vm1, %v866_v61 }
 0x31e   : > { %2116 = vmatmul.mubr.msk.bf16.gmra.mrb[12].mxu1 %vm714_vm1, %v867_v8 }
 0x31f   : > { %2119 = vmatprep.mubr.msk.bf16.mxu1 %vm714_vm1, %v868_v9 }
 0x326   : > { %2120 = vmatmul.mubr.msk.bf16.gmra.mrb[0].mxu1 %vm714_vm1, %v869_v20 }
 0x327   : > { %2123 = vmatprep.mubr.msk.bf16.mxu1 %vm714_vm1, %v870_v21 }
 0x32e   : > { %2124 = vmatmul.mubr.msk.bf16.gmra.mrb[4].mxu1 %vm714_vm1, %v871_v28 }
 0x3c9   : > { %v2089_v29 = vpop.f32.mrb[16].mxu0 }
 0x3ca   : > { %v1193_v30 = vpop.f32.mrb[17].mxu0 }
 0x3cb   : > { %v2090_v31 = vpop.f32.mrb[18].mxu0 }
 0x3cc   : > { %v1196_v32 = vpop.f32.mrb[19].mxu0 }
 0x3d1   : > { %v2093_v33 = vpop.f32.mrb[20].mxu0 }
 0x3d2   : > { %v1209_v35 = vpop.f32.mrb[21].mxu0 }
 0x3d3   : > { %v2094_v37 = vpop.f32.mrb[22].mxu0 }
 0x3d4   : > { %v1212_v40 = vpop.f32.mrb[23].mxu0 }
 0x3e9   : > { %v2113_v43 = vpop.f32.mrb[8].mxu1 }
 0x3ea   : > { %v1347_v44 = vadd.f32 %v2113_v43, %v2089_v29  ;;  %v1338_v45 = vpop.f32.mrb[9].mxu1 }
 0x3eb   : > { %v1339_v46 = vadd.f32 %v1338_v45, %v1193_v30  ;;  %v2114_v47 = vpop.f32.mrb[10].mxu1 }
 0x3ec   : > { %v1407_v34 = vadd.f32 %v3386_v42, %v1347_v44  ;;  %v1350_v48 = vadd.f32 %v2114_v47, %v2090_v31  ;;  %v1341_v49 = vpop.f32.mrb[11].mxu1 }
 0x3ed   : > { %v1405_v50 = vadd.f32 %v3386_v42, %v1339_v46  ;;  %v1342_v51 = vadd.f32 %v1341_v49, %v1196_v32 }
 0x3ee   : > { %v1423_v52 = vmax.f32 %v1407_v34, 0.0  ;;  %v1408_v39 = vadd.f32 %v3386_v42, %v1350_v48 }
 0x3ef   : > { %v1406_v36 = vadd.f32 %v3386_v42, %v1342_v51  ;;  %v1421_v38 = vmax.f32 %v1405_v50, 0.0 }
 0x3f0   : > { %v1956_v53 = vpack.c.bf16 %v1423_v52, %v1423_v52  ;;  %v1424_v54 = vmax.f32 %v1408_v39, 0.0 }
 0x3f1   : > { %v2117_v55 = vpop.f32.mrb[12].mxu1  ;;  %v1422_v57 = vmax.f32 %v1406_v36, 0.0  ;;  %v1954_v62 = vpack.c.bf16 %v1421_v38, %v1421_v38 }
 0x3f2   : > { %v1957_v56 = vpack.c.bf16 %v1424_v54, %v1424_v54  ;;  %v1363_v58 = vadd.f32 %v2117_v55, %v2093_v33  ;;  %v1354_v59 = vpop.f32.mrb[13].mxu1  ;;  %1562 = vrot.lane.b32.xlu0 %v1956_v53, %s2732_s25 }
 0x3f3   : > { %v1355_v60 = vadd.f32 %v1354_v59, %v1209_v35  ;;  %v2118_v61 = vpop.f32.mrb[14].mxu1  ;;  %v1955_v0 = vpack.c.bf16 %v1422_v57, %v1422_v57 }
 0x3f4   : > { %v1411_v63 = vadd.f32 %v3386_v42, %v1363_v58  ;;  %v1366_v1 = vadd.f32 %v2118_v61, %v2094_v37  ;;  %v1357_v2 = vpop.f32.mrb[15].mxu1  ;;  %1564 = vrot.lane.b32.xlu1 %v1957_v56, %s2732_s25 }
 0x3f5   : > { %v1409_v3 = vadd.f32 %v3386_v42, %v1355_v60  ;;  %v1358_v4 = vadd.f32 %v1357_v2, %v1212_v40 }
 0x3f6   : > { %v1427_v5 = vmax.f32 %v1411_v63, 0.0  ;;  %v1412_v6 = vadd.f32 %v3386_v42, %v1366_v1  ;;  %1558 = vrot.lane.b32.xlu0 %v1954_v62, %s2732_s25 }
 0x3f7   : > { %v1410_v7 = vadd.f32 %v3386_v42, %v1358_v4  ;;  %v1425_v9 = vmax.f32 %v1409_v3, 0.0 }
 0x3f8   : > { %v1960_v8 = vpack.c.bf16 %v1427_v5, %v1427_v5  ;;  %v1428_v10 = vmax.f32 %v1412_v6, 0.0  ;;  %1560 = vrot.lane.b32.xlu1 %v1955_v0, %s2732_s25 }
 0x3f9   : > { %v2121_v11 = vpop.f32.mrb[0].mxu1  ;;  %v1426_v13 = vmax.f32 %v1410_v7, 0.0  ;;  %v1958_v17 = vpack.c.bf16 %v1425_v9, %v1425_v9 }
 0x3fa   : > { %v1961_v12 = vpack.c.bf16 %v1428_v10, %v1428_v10  ;;  %v1415_v14 = vadd.f32 %v2121_v11, %v3386_v42  ;;  %v1370_v15 = vpop.f32.mrb[1].mxu1  ;;  %1570 = vrot.lane.b32.xlu0 %v1960_v8, %s2732_s25 }
 0x3fb   : > { %v2122_v16 = vpop.f32.mrb[2].mxu1  ;;  %v1413_v19 = vadd.f32 %v3386_v42, %v1370_v15  ;;  %v1959_v22 = vpack.c.bf16 %v1426_v13, %v1426_v13 }
 0x3fc   : > { %v1431_v18 = vmax.f32 %v1415_v14, 0.0  ;;  %v1416_v20 = vadd.f32 %v2122_v16, %v3386_v42  ;;  %v1373_v21 = vpop.f32.mrb[3].mxu1  ;;  %1572 = vrot.lane.b32.xlu1 %v1961_v12, %s2732_s25 }
 0x3fd   : > { %v1414_v24 = vadd.f32 %v3386_v42, %v1373_v21  ;;  %v1429_v26 = vmax.f32 %v1413_v19, 0.0 }
 0x3fe   : > { %v1432_v23 = vmax.f32 %v1416_v20, 0.0  ;;  %1566 = vrot.lane.b32.xlu0 %v1958_v17, %s2732_s25  ;;  %v1964_v25 = vpack.c.bf16 %v1431_v18, %v1431_v18 }
 0x3ff   : > { %v1430_v29 = vmax.f32 %v1414_v24, 0.0  ;;  %v1962_v33 = vpack.c.bf16 %v1429_v26, %v1429_v26 }
 0x400   : > { %1568 = vrot.lane.b32.xlu1 %v1959_v22, %s2732_s25  ;;  %v1965_v28 = vpack.c.bf16 %v1432_v23, %v1432_v23 }
 0x401   : > { %v2125_v27 = vpop.f32.mrb[4].mxu1  ;;  %v1963_v43 = vpack.c.bf16 %v1430_v29, %v1430_v29 }
 0x402   : > { %v1386_v30 = vpop.f32.mrb[5].mxu1  ;;  %1578 = vrot.lane.b32.xlu0 %v1964_v25, %s2732_s25  ;;  %v1419_v35 = vadd.f32 %v2125_v27, %v3386_v42 }
 0x403   : > { %v1417_v31 = vadd.f32 %v3386_v42, %v1386_v30  ;;  %v2126_v32 = vpop.f32.mrb[6].mxu1 }
 0x404   : > { %v1389_v37 = vpop.f32.mrb[7].mxu1  ;;  %1580 = vrot.lane.b32.xlu1 %v1965_v28, %s2732_s25  ;;  %v1420_v44 = vadd.f32 %v2126_v32, %v3386_v42  ;;  %v1435_v47 = vmax.f32 %v1419_v35, 0.0 }
 0x405   : > { %v1433_v40 = vmax.f32 %v1417_v31, 0.0  ;;  %v1418_v41 = vadd.f32 %v3386_v42, %v1389_v37 }
 0x406   : > { %1574 = vrot.lane.b32.xlu0 %v1962_v33, %s2732_s25  ;;  %v1436_v48 = vmax.f32 %v1420_v44, 0.0  ;;  %v1968_v49 = vpack.c.bf16 %v1435_v47, %v1435_v47 }
 0x407   : > { %v1966_v45 = vpack.c.bf16 %v1433_v40, %v1433_v40  ;;  %v1434_v46 = vmax.f32 %v1418_v41, 0.0 }
 0x408   : > { %1576 = vrot.lane.b32.xlu1 %v1963_v43, %s2732_s25  ;;  %v1969_v42 = vpack.c.bf16 %v1436_v48, %v1436_v48 }
 0x409   : > { %v1967_v34 = vpack.c.bf16 %v1434_v46, %v1434_v46 }
 0x40a   : > { %1582 = vrot.lane.b32.xlu0 %v1966_v45, %s2732_s25 }
 0x40c   : > { %1584 = vrot.lane.b32.xlu1 %v1967_v34, %s2732_s25 }
 0x40e   : > { %1586 = vrot.lane.b32.xlu0 %v1968_v49, %s2732_s25 }
 0x410   : > { %1588 = vrot.lane.b32.xlu1 %v1969_v42, %s2732_s25 }
 0x464   : > { %v1563_v50 = vpop.permute.xlu0 %1562 }
 0x465   : > { %1609 = vst.msk [vmem:[%s3221_s15 + $0x8] sm:$0xf] %vm1606_vm3, %v1563_v50 }
 0x466   : > { %v1565_v51 = vpop.permute.xlu1 %1564 }
 0x467   : > { %1610 = vst.msk [vmem:[%s3221_s15 + $0xc] sm:$0xf] %vm1606_vm3, %v1565_v51 }
 0x468   : > { %v1559_v52 = vpop.permute.xlu0 %1558 }
 0x469   : > { %1607 = vst.msk [vmem:[%s3221_s15] sm:$0xf] %vm1606_vm3, %v1559_v52 }
 0x46a   : > { %v1561_v39 = vpop.permute.xlu1 %1560 }
 0x46b   : > { %1608 = vst.msk [vmem:[%s3221_s15 + $0x4] sm:$0xf] %vm1606_vm3, %v1561_v39 }
 0x46c   : > { %v1571_v36 = vpop.permute.xlu0 %1570 }
 0x46d   : > { %1613 = vst.msk [vmem:[%s3221_s15 + $0x18] sm:$0xf] %vm1606_vm3, %v1571_v36 }
 0x46e   : > { %v1573_v53 = vpop.permute.xlu1 %1572 }
 0x46f   : > { %1614 = vst.msk [vmem:[%s3221_s15 + $0x1c] sm:$0xf] %vm1606_vm3, %v1573_v53 }
 0x470   : > { %v1567_v38 = vpop.permute.xlu0 %1566 }
 0x471   : > { %1611 = vst.msk [vmem:[%s3221_s15 + $0x10] sm:$0xf] %vm1606_vm3, %v1567_v38 }
 0x472   : > { %v1569_v54 = vpop.permute.xlu1 %1568 }
 0x473   : > { %1612 = vst.msk [vmem:[%s3221_s15 + $0x14] sm:$0xf] %vm1606_vm3, %v1569_v54 }
 0x474   : > { %v1579_v55 = vpop.permute.xlu0 %1578 }
 0x475   : > { %1617 = vst.msk [vmem:[%s3221_s15 + $0x28] sm:$0xf] %vm1606_vm3, %v1579_v55 }
 0x476   : > { %v1581_v56 = vpop.permute.xlu1 %1580 }
 0x477   : > { %1618 = vst.msk [vmem:[%s3221_s15 + $0x2c] sm:$0xf] %vm1606_vm3, %v1581_v56 }
 0x478   : > { %v1575_v57 = vpop.permute.xlu0 %1574 }
 0x479   : > { %1615 = vst.msk [vmem:[%s3221_s15 + $0x20] sm:$0xf] %vm1606_vm3, %v1575_v57 }
 0x47a   : > { %v1577_v58 = vpop.permute.xlu1 %1576 }
 0x47b   : > { %1616 = vst.msk [vmem:[%s3221_s15 + $0x24] sm:$0xf] %vm1606_vm3, %v1577_v58 }
 0x47c   : > { %v1583_v59 = vpop.permute.xlu0 %1582 }
 0x47d   : > { %1619 = vst.msk [vmem:[%s3221_s15 + $0x30] sm:$0xf] %vm1606_vm3, %v1583_v59 }
 0x47e   : > { %v1585_v60 = vpop.permute.xlu1 %1584 }
 0x47f   : > { %1620 = vst.msk [vmem:[%s3221_s15 + $0x34] sm:$0xf] %vm1606_vm3, %v1585_v60 }
 0x480   : > { %v1587_v61 = vpop.permute.xlu0 %1586 }
 0x481   : > { %1621 = vst.msk [vmem:[%s3221_s15 + $0x38] sm:$0xf] %vm1606_vm3, %v1587_v61 }
 0x482   : > { %v1589_v62 = vpop.permute.xlu1 %1588 }
 0x483   : > { %1622 = vst.msk [vmem:[%s3221_s15 + $0x3c] sm:$0xf] %vm1606_vm3, %v1589_v62 }
 0x484 PF: > { %s3640_s20 = sld [smem:[#allocation26_spill]]  ;;  %s3641_s29 = sld [smem:[#allocation40_spill]] }
 0x485   : > { %s1637_s5 = sshll.u32 %s3221_s15, 4  ;;  %s1624_s24 = scalar_lea.sflag [#allocation5], %s3181_s2  ;;  %s3459_s5 = int_to_ptr.vmem [resolvable:$true] %s1637_s5 }
 0x486   : > { %s2552_s13 = scalar_lea.vmem %s3459_s5, 1024  ;;  %p3643_p2 = scmp.ne.s32.totalorder %s3607_s21, 0 }
 0x487   : > { %p2553_p8 = scmp.ne.s32.totalorder %s3459_s5, %s2552_s13  ;;  %s2733_s30 = smov [#allocation14]  }
 0x488   : > { %s2556_s6 = sshll.u32 %s2733_s30, 4  ;;  %s2557_s6 = int_to_ptr.vmem [resolvable:$false] %s2556_s6 }
 0x489   : > { %p2554_p5 = pnand %p2553_p8, %p3643_p2  ;;  %s2558_s16 = scalar_lea.vmem %s2557_s6, 2048 }
 0x48a   : > { %s1970_s18 = sshll.u32 %s3640_s20, 10  ;;  %s3642_s0 = smov %s3641_s29 }
 0x48b   : > { %s3456_s12 = scalar_lea.hbm %s3641_s29, %s1970_s18  ;;  %p2555_p7 = pneg %p2554_p5 }
 0x48c   : > { %p2559_p4 = scmp.lt.s32.totalorder %s3459_s5, %s2557_s6  ;;  %p2560_p13 = scmp.lt.s32.totalorder %s2558_s16, %s2552_s13 }
 0x48e   : > { %p2561_p11 = por %p2560_p13, %p2559_p4 }
 0x490   : > { %p2562_p12 = pnand %p2561_p11, %p2555_p7 }
 0x492   : > { %2565 = shalt.err (!%p2562_p12)
}
 0x493   : > { %s2566_s19 = scalar_lea.hbm %s3456_s12, 1024  ;;  %s2570_s14 = scalar_lea.hbm %s3642_s0, 2048 }
 0x494   : > { %p2567_p10 = scmp.ne.s32.totalorder %s3456_s12, %s2566_s19  ;;  %p2571_p1 = scmp.lt.u32.totalorder %s3456_s12, %s3642_s0 }
 0x495   : > { %p2572_p6 = scmp.lt.u32.totalorder %s2570_s14, %s2566_s19  ;;  %p2574_p8 = scmp.lt.u32.totalorder %s2566_s19, %s3456_s12 }
 0x496   : > { %p2568_p9 = pnand %p2567_p10, %p3643_p2 }
 0x497   : > { %p2573_p3 = por %p2572_p6, %p2571_p1 }
 0x498   : > { %p2569_p0 = pneg %p2568_p9 }
 0x499   : > { %p2575_p5 = por %p2574_p8, %p2573_p3 }
 0x49b   : > { %p2576_p7 = pnand %p2575_p5, %p2569_p0 }
 0x49d   : > { %2579 = shalt.err (!%p2576_p7)
}
 0x49e   : > { %s2734_s20 = smov 64   ;;  %s2735_s18 = smov 4  }
 0x49f   : > { %2183 = dma.vmem_to_hbm [thread:$0]  (%p3643_p2), %s3459_s5, 1024, %s3456_s12, %s1624_s24, %s2734_s20, %s2734_s20, %s2735_s18  }
 0x4a0 PF: > { %s3644_s1 = sld [smem:[#allocation33_spill]]  ;;  %p2214_p4 = scmp.ge.s32.totalorder %s2718_s10, 2 }
 0x4a1   : > { %s1652_s17 = sand.u32 1, %s2690_s27  }
 0x4a2   : > { %s1653_s29 = scalar_lea.sflag [#allocation5], %s1652_s17 }
 0x4a6   : > { %p3645_p13 = scmp.ne.s32.totalorder %s3644_s1, 0 }
 0x4a8   : > { %p2206_p11 = pnand %p2214_p4, %p3645_p13 }
 0x4aa   : > { %2661 = dma.done.wait (!%p2206_p11), %s1653_s29, 1024  }
 0x4ab   : > { %2663 = vsyncadd (!%p2206_p11), %s1653_s29, 4294966272  ;;  %s29_s10 = sadd.s32 1, %s2718_s10   ;;  %s3647_s24 = sld [smem:[#allocation23_spill]] }
 0x4ac   : > { %p3490_p12 = scmp.ge.s32.totalorder %s29_s10, 6   ;;  %s3648_s2 = sld [smem:[#allocation31_spill]] }
 0x4ad   : > { %s3649_s12 = sld [smem:[#allocation24_spill]]  ;;  %s3650_s29 = sld [smem:[#allocation32_spill]] }
 0x4ae   : > { %s3651_s5 = sld [smem:[#allocation28_spill]]  ;;  %s3652_s6 = sld [smem:[#allocation29_spill]] }
 0x4af   : > { %s3653_s21 = smov %s2670_s22  ;;  %s3654_s22 = smov %s2674_s23 }
 0x4b0   : > { %s3655_s23 = smov %s3081_s3  ;;  %s3656_s25 = smov %s2686_s26 }
 0x4b1   : > { %s3658_s27 = smov %s2694_s28  ;;  %s3660_s30 = smov %s2710_s8 }
 0x4b2   : > { %s3657_s26 = smov %s3648_s2  ;;  %s3661_s7 = smov %s2714_s9 }
 0x4b3   : > { %s3659_s28 = smov %s3649_s12  ;;  %28 = sbr.rel (!%p3490_p12) target bundleno = 23 (0x17), region = 144 }
 0x4b4   : > { %s3662_s8 = smov %s3651_s5  ;;  %s3663_s9 = smov %s3652_s6 }
 0x4ba   :  { %1658 = vsyncpa [#allocation4], 1 }
 0x4bb   :  { %1660 = vsyncpa [#allocation4 + $0x1], 1 }
 0x4bc   :  { %1661 = vsyncpa [#allocation7], 1 }
 0x4bd   :  { %1663 = vsyncpa [#allocation7 + $0x1], 1 }
 0x4be   :  { %1664 = vsyncpa [#allocation10], 1 }
 0x4bf   :  { %1666 = vsyncpa [#allocation10 + $0x1], 1 }
 0x4c0   :  { %1667 = vsyncpa [#allocation13], 1 }
 0x4c1   :  { %1668 = vsyncpa [#allocation5], 1 }
 0x4c2   :  { %1670 = vsyncpa [#allocation5 + $0x1], 1 }

</bundles_post_ra>
